<compile_context>
chip_gen: v6e
topology: v6e:2x2x1
jax: 0.10.0
libtpu: 0.0.40
codegen_flags: <defaults>
</compile_context>

<pallas_src>
import functools

import numpy as np
import jax
import jax.numpy as jnp
from jax import lax
from jax.experimental import pallas as pl
from jax.experimental.pallas import tpu as pltpu


# ----------------------------- Pallas kernel ------------------------------- #

def _sepconv_kernel(xe_ref, mask_ref, dw1_ref, pw1_ref, s1_ref, b1_ref,
                    dw2_ref, pw2_ref, s2_ref, b2_ref, out_ref, y_ref,
                    *, K, Wp, C_in, C_out):
    # Widths (all on the lane axis):
    #   out_ref : (C_out, NL)            NL = N * Hp * Wp (flat padded batch)
    #   y_ref   : (C_in,  NL + 2G)       G  = P*Wp + P (flat center-tap offset)
    #   xe_ref  : (C_in,  NL + 4G)
    Wmid = y_ref.shape[1]
    Wout = out_ref.shape[1]

    # ---- stage 1: ReLU (the zero halo/padding stays zero) -----------------
    xe = jnp.maximum(xe_ref[...], 0.0)                        # (C_in, Wout+4G)

    # ---- stage 2: depthwise KxK conv #1 -----------------------------------
    # Centered taps = constant-offset lane slices of the halo-extended slab.
    # Immediate accumulation keeps vreg pressure bounded (one tap live).
    dw1 = dw1_ref[...]                                        # (C_in, K*K)
    acc1 = xe[:, 0:Wmid] * dw1[:, 0:1]
    for t in range(1, K * K):
        off = (t // K) * Wp + (t % K)
        acc1 = acc1 + xe[:, off:off + Wmid] * dw1[:, t:t + 1]

    # ---- stages 3/4: 1x1 conv (Cin->Cin) + folded BN1 + ReLU --------------
    # Channels are tiny, so the pointwise conv is an unrolled VPU
    # broadcast-FMA over SMEM scalars (no MXU).  The mask re-zeroes the
    # padding ring / halo so y_ref is the properly zero-padded input of the
    # second depthwise conv.  Row stores are full-lane-width (lane-dense).
    mask = mask_ref[...]                                      # (1, Wmid)
    rows1 = [acc1[c:c + 1, :] for c in range(C_in)]           # hoisted views
    for co in range(C_in):
        r = rows1[0] * pw1_ref[0, co]
        for ci in range(1, C_in):
            r = r + rows1[ci] * pw1_ref[ci, co]
        r = jnp.maximum(r * s1_ref[co] + b1_ref[co], 0.0)
        y_ref[co:co + 1, :] = r * mask

    # ---- stage 5: depthwise KxK conv #2 -----------------------------------
    y = y_ref[...]                                            # (C_in, Wmid)
    dw2 = dw2_ref[...]
    acc2 = y[:, 0:Wout] * dw2[:, 0:1]
    for t in range(1, K * K):
        off = (t // K) * Wp + (t % K)
        acc2 = acc2 + y[:, off:off + Wout] * dw2[:, t:t + 1]

    # ---- stage 6: 1x1 conv (Cin->Cout) + folded BN2 -----------------------
    rows2 = [acc2[c:c + 1, :] for c in range(C_in)]
    for co in range(C_out):
        r = rows2[0] * pw2_ref[0, co]
        for ci in range(1, C_in):
            r = r + rows2[ci] * pw2_ref[ci, co]
        out_ref[co:co + 1, :] = r * s2_ref[co] + b2_ref[co]


# ------------------------------- wrapper ------------------------------------ #

def sepconv_forward(x_nchw, kparams, *, kernel_size, stride, padding):
    """x_nchw: (N, C_in, H, W) float32. Returns (N, C_out, H, W)."""
    N, C_in, H, W = x_nchw.shape
    K, P = kernel_size, padding
    assert stride == 1 and K == 2 * P + 1, (
        "this Pallas instantiation covers the stride=1 'same' SepConv configs")
    # TODO(synk): generalize to stride>1 / non-'same' kernel-padding combos.
    C_out = kparams["pw2"].shape[1]

    Hp, Wp = H + 2 * P, W + 2 * P
    L = Hp * Wp                   # flat padded image size
    NL = N * L                    # whole batch flattened on the lane axis
    G = P * Wp + P                # flat offset of the conv center tap
    Wmid = NL + 2 * G             # stage-1 output width (with halo)
    Win = NL + 4 * G              # halo-extended input width

    # Wrapper-side layout prep (cheap XLA): spatial zero pad, channels-major
    # flattening, flat halo so every in-kernel tap slice is in-bounds.
    xp = jnp.pad(x_nchw.astype(jnp.float32), ((0, 0), (0, 0), (P, P), (P, P)))
    xf = jnp.transpose(xp, (1, 0, 2, 3)).reshape(C_in, NL)
    xe = jnp.pad(xf, ((0, 0), (2 * G, 2 * G)))

    # Mask of "real image content" positions on the flattened padded grid,
    # used to re-zero the padding ring between the two depthwise convs.
    m = np.zeros((Hp, Wp), np.float32)
    m[P:P + H, P:P + W] = 1.0
    mask = np.zeros((1, Wmid), np.float32)
    mask[0, G:G + NL] = np.tile(m.reshape(-1), N)
    mask = jnp.asarray(mask)

    kern = functools.partial(_sepconv_kernel, K=K, Wp=Wp,
                             C_in=C_in, C_out=C_out)
    smem = pl.BlockSpec(memory_space=pltpu.MemorySpace.SMEM)

    out_flat = pl.pallas_call(
        kern,
        out_shape=jax.ShapeDtypeStruct((C_out, NL), jnp.float32),
        grid_spec=pltpu.PrefetchScalarGridSpec(
            num_scalar_prefetch=0,
            grid=(1,),                      # whole (small) batch per step
            in_specs=[
                pl.BlockSpec((C_in, Win), lambda b: (0, 0)),      # xe
                pl.BlockSpec((1, Wmid), lambda b: (0, 0)),        # mask
                pl.BlockSpec((C_in, K * K), lambda b: (0, 0)),    # dw1
                smem,                                             # pw1
                smem,                                             # s1
                smem,                                             # b1
                pl.BlockSpec((C_in, K * K), lambda b: (0, 0)),    # dw2
                smem,                                             # pw2
                smem,                                             # s2
                smem,                                             # b2
            ],
            out_specs=pl.BlockSpec((C_out, NL), lambda b: (0, 0)),
            scratch_shapes=[pltpu.VMEM((C_in, Wmid), jnp.float32)],
        ),
        compiler_params=pltpu.CompilerParams(
            dimension_semantics=("parallel",),
            vmem_limit_bytes=32 * 1024 * 1024),
    )(xe, mask, kparams["dw1"], kparams["pw1"], kparams["s1"], kparams["b1"],
      kparams["dw2"], kparams["pw2"], kparams["s2"], kparams["b2"])

    # Crop the valid (centered) region and go back to NCHW.
    out = out_flat.reshape(C_out, N, Hp, Wp)[:, :, P:P + H, P:P + W]
    return jnp.transpose(out, (1, 0, 2, 3))


# --------------------- parameter setup (deterministic) ---------------------- #

def make_params(key, C_in, C_out, K, H1, H2, eps=1e-5):
    ks = jax.random.split(key, 12)
    raw = {
        # PyTorch layouts: depthwise (Cin,1,K,K); pointwise (Cout,Cin,1,1)
        "dw1": 0.2 * jax.random.normal(ks[0], (C_in, 1, K, K), jnp.float32),
        "pw1": 0.2 * jax.random.normal(ks[1], (C_in, C_in, 1, 1), jnp.float32),
        "g1": 1.0 + 0.1 * jax.random.normal(ks[2], (C_in,), jnp.float32),
        "b1": 0.1 * jax.random.normal(ks[3], (C_in,), jnp.float32),
        "m1": 0.05 * jax.random.normal(ks[4], (C_in,), jnp.float32),
        "v1": 1.0 + 0.2 * jax.random.uniform(ks[5], (C_in,), jnp.float32),
        "dw2": 0.2 * jax.random.normal(ks[6], (C_in, 1, K, K), jnp.float32),
        "pw2": 0.2 * jax.random.normal(ks[7], (C_out, C_in, 1, 1), jnp.float32),
        "g2": 1.0 + 0.1 * jax.random.normal(ks[8], (C_out,), jnp.float32),
        "b2": 0.1 * jax.random.normal(ks[9], (C_out,), jnp.float32),
        "m2": 0.05 * jax.random.normal(ks[10], (C_out,), jnp.float32),
        "v2": 1.0 + 0.2 * jax.random.uniform(ks[11], (C_out,), jnp.float32),
    }

    def fold_bn(g, b, m, v, identity):
        if identity:   # AdaptiveBatchNorm2d: identity when spatial H == 1
            return jnp.ones_like(g), jnp.zeros_like(b)
        s = g / jnp.sqrt(v + eps)
        return s, b - m * s

    s1, sh1 = fold_bn(raw["g1"], raw["b1"], raw["m1"], raw["v1"], H1 == 1)
    s2, sh2 = fold_bn(raw["g2"], raw["b2"], raw["m2"], raw["v2"], H2 == 1)

    kparams = {
        # depthwise: dw[c, kh*K + kw] = w_torch[c, 0, kh, kw]
        "dw1": raw["dw1"][:, 0].reshape(C_in, K * K),
        "dw2": raw["dw2"][:, 0].reshape(C_in, K * K),
        # pointwise: pw[ci, co] = w_torch[co, ci, 0, 0]
        "pw1": raw["pw1"][:, :, 0, 0].T,
        "pw2": raw["pw2"][:, :, 0, 0].T,
        # folded BN scale/shift (1-D, consumed as SMEM scalars)
        "s1": s1, "b1": sh1, "s2": s2, "b2": sh2,
    }
    return raw, kparams


# ----------------------- pure-JAX reference (checking) ---------------------- #

def sepconv_reference(x_nchw, raw, *, kernel_size, stride, padding, eps=1e-5):
    dn = ("NCHW", "OIHW", "NCHW")
    C_in = x_nchw.shape[1]

    def bn(y, g, b, m, v):
        if y.shape[-2] == 1:
            return y
        s = g / jnp.sqrt(v + eps)
        return (y - m[None, :, None, None]) * s[None, :, None, None] \
            + b[None, :, None, None]

    y = jax.nn.relu(x_nchw)
    y = lax.conv_general_dilated(y, raw["dw1"], (stride, stride),
                                 [(padding, padding)] * 2,
                                 dimension_numbers=dn,
                                 feature_group_count=C_in)
    y = lax.conv_general_dilated(y, raw["pw1"], (1, 1), [(0, 0), (0, 0)],
                                 dimension_numbers=dn)
    y = bn(y, raw["g1"], raw["b1"], raw["m1"], raw["v1"])
    y = jax.nn.relu(y)
    y = lax.conv_general_dilated(y, raw["dw2"], (1, 1),
                                 [(padding, padding)] * 2,
                                 dimension_numbers=dn,
                                 feature_group_count=C_in)
    y = lax.conv_general_dilated(y, raw["pw2"], (1, 1), [(0, 0), (0, 0)],
                                 dimension_numbers=dn)
    y = bn(y, raw["g2"], raw["b2"], raw["m2"], raw["v2"])
    return y


# ---------------------------------- main ------------------------------------ #

if __name__ == "__main__":
    N, C_in, C_out = 2, 4, 8
    H = W = 16
    K, stride, padding = 3, 1, 1

    H1 = (H + 2 * padding - K) // stride + 1
    H2 = H1 + 2 * padding - K + 1

    key = jax.random.PRNGKey(0)
    kx, kp = jax.random.split(key)
    x = jax.random.normal(kx, (N, C_in, H, W), jnp.float32)

    raw, kparams = make_params(kp, C_in, C_out, K, H1, H2)

    out = sepconv_forward(x, kparams, kernel_size=K, stride=stride,
                          padding=padding)
    out = jax.block_until_ready(out)

    ref = jax.block_until_ready(
        sepconv_reference(x, raw, kernel_size=K, stride=stride,
                          padding=padding))

    assert out.shape == ref.shape, (out.shape, ref.shape)
    np.testing.assert_allclose(np.asarray(out), np.asarray(ref),
                               rtol=1e-4, atol=1e-4)
    print("KERNEL_OK")
</pallas_src>

<mosaic_0001>
module attributes {stable_mosaic.version = 11 : i64} {
  func.func @_sepconv_kernel(%arg0: i32, %arg1: memref<4x724xf32, #tpu.memory_space<vmem>>, %arg2: memref<1x686xf32, #tpu.memory_space<vmem>>, %arg3: memref<4x9xf32, #tpu.memory_space<vmem>>, %arg4: memref<4x4xf32, #tpu.memory_space<smem>>, %arg5: memref<4xf32, #tpu.memory_space<smem>>, %arg6: memref<4xf32, #tpu.memory_space<smem>>, %arg7: memref<4x9xf32, #tpu.memory_space<vmem>>, %arg8: memref<4x8xf32, #tpu.memory_space<smem>>, %arg9: memref<8xf32, #tpu.memory_space<smem>>, %arg10: memref<8xf32, #tpu.memory_space<smem>>, %arg11: memref<8x648xf32, #tpu.memory_space<vmem>>, %arg12: memref<4x686xf32, #tpu.memory_space<vmem>>) attributes {dimension_semantics = [#tpu.dimension_semantics<parallel>], iteration_bounds = array<i64: 1>, scalar_prefetch = 0 : i64, scratch_operands = 1 : i64, tpu.core_type = #tpu.core_type<tc>, window_params = [{pipeline_mode = #tpu.pipeline_mode<synchronous>, transform_indices = @transform_0, window_bounds = array<i64: 4, 724>}, {pipeline_mode = #tpu.pipeline_mode<synchronous>, transform_indices = @transform_1, window_bounds = array<i64: 1, 686>}, {pipeline_mode = #tpu.pipeline_mode<synchronous>, transform_indices = @transform_2, window_bounds = array<i64: 4, 9>}, {transform_indices = @transform_3, window_bounds = array<i64: 4, 4>}, {transform_indices = @transform_4, window_bounds = array<i64: 4>}, {transform_indices = @transform_5, window_bounds = array<i64: 4>}, {pipeline_mode = #tpu.pipeline_mode<synchronous>, transform_indices = @transform_6, window_bounds = array<i64: 4, 9>}, {transform_indices = @transform_7, window_bounds = array<i64: 4, 8>}, {transform_indices = @transform_8, window_bounds = array<i64: 8>}, {transform_indices = @transform_9, window_bounds = array<i64: 8>}, {pipeline_mode = #tpu.pipeline_mode<synchronous>, transform_indices = @transform_10, window_bounds = array<i64: 8, 648>}]} {
    %c0 = arith.constant 0 : index
    %c0_0 = arith.constant 0 : index
    %0 = vector.load %arg1[%c0, %c0_0] : memref<4x724xf32, #tpu.memory_space<vmem>>, vector<4x724xf32>
    %cst = arith.constant 0.000000e+00 : f32
    %1 = vector.broadcast %cst : f32 to vector<4x724xf32>
    %2 = arith.maximumf %0, %1 : vector<4x724xf32>
    %c0_1 = arith.constant 0 : index
    %c0_2 = arith.constant 0 : index
    %3 = vector.load %arg3[%c0_1, %c0_2] : memref<4x9xf32, #tpu.memory_space<vmem>>, vector<4x9xf32>
    %4 = vector.extract_strided_slice %2 {offsets = [0, 0], sizes = [4, 686], strides = [1, 1]} : vector<4x724xf32> to vector<4x686xf32>
    %5 = vector.extract_strided_slice %3 {offsets = [0, 0], sizes = [4, 1], strides = [1, 1]} : vector<4x9xf32> to vector<4x1xf32>
    %6 = vector.broadcast %5 : vector<4x1xf32> to vector<4x686xf32>
    %7 = arith.mulf %4, %6 : vector<4x686xf32>
    %8 = vector.extract_strided_slice %2 {offsets = [0, 1], sizes = [4, 686], strides = [1, 1]} : vector<4x724xf32> to vector<4x686xf32>
    %9 = vector.extract_strided_slice %3 {offsets = [0, 1], sizes = [4, 1], strides = [1, 1]} : vector<4x9xf32> to vector<4x1xf32>
    %10 = vector.broadcast %9 : vector<4x1xf32> to vector<4x686xf32>
    %11 = arith.mulf %8, %10 : vector<4x686xf32>
    %12 = arith.addf %7, %11 : vector<4x686xf32>
    %13 = vector.extract_strided_slice %2 {offsets = [0, 2], sizes = [4, 686], strides = [1, 1]} : vector<4x724xf32> to vector<4x686xf32>
    %14 = vector.extract_strided_slice %3 {offsets = [0, 2], sizes = [4, 1], strides = [1, 1]} : vector<4x9xf32> to vector<4x1xf32>
    %15 = vector.broadcast %14 : vector<4x1xf32> to vector<4x686xf32>
    %16 = arith.mulf %13, %15 : vector<4x686xf32>
    %17 = arith.addf %12, %16 : vector<4x686xf32>
    %18 = vector.extract_strided_slice %2 {offsets = [0, 18], sizes = [4, 686], strides = [1, 1]} : vector<4x724xf32> to vector<4x686xf32>
    %19 = vector.extract_strided_slice %3 {offsets = [0, 3], sizes = [4, 1], strides = [1, 1]} : vector<4x9xf32> to vector<4x1xf32>
    %20 = vector.broadcast %19 : vector<4x1xf32> to vector<4x686xf32>
    %21 = arith.mulf %18, %20 : vector<4x686xf32>
    %22 = arith.addf %17, %21 : vector<4x686xf32>
    %23 = vector.extract_strided_slice %2 {offsets = [0, 19], sizes = [4, 686], strides = [1, 1]} : vector<4x724xf32> to vector<4x686xf32>
    %24 = vector.extract_strided_slice %3 {offsets = [0, 4], sizes = [4, 1], strides = [1, 1]} : vector<4x9xf32> to vector<4x1xf32>
    %25 = vector.broadcast %24 : vector<4x1xf32> to vector<4x686xf32>
    %26 = arith.mulf %23, %25 : vector<4x686xf32>
    %27 = arith.addf %22, %26 : vector<4x686xf32>
    %28 = vector.extract_strided_slice %2 {offsets = [0, 20], sizes = [4, 686], strides = [1, 1]} : vector<4x724xf32> to vector<4x686xf32>
    %29 = vector.extract_strided_slice %3 {offsets = [0, 5], sizes = [4, 1], strides = [1, 1]} : vector<4x9xf32> to vector<4x1xf32>
    %30 = vector.broadcast %29 : vector<4x1xf32> to vector<4x686xf32>
    %31 = arith.mulf %28, %30 : vector<4x686xf32>
    %32 = arith.addf %27, %31 : vector<4x686xf32>
    %33 = vector.extract_strided_slice %2 {offsets = [0, 36], sizes = [4, 686], strides = [1, 1]} : vector<4x724xf32> to vector<4x686xf32>
    %34 = vector.extract_strided_slice %3 {offsets = [0, 6], sizes = [4, 1], strides = [1, 1]} : vector<4x9xf32> to vector<4x1xf32>
    %35 = vector.broadcast %34 : vector<4x1xf32> to vector<4x686xf32>
    %36 = arith.mulf %33, %35 : vector<4x686xf32>
    %37 = arith.addf %32, %36 : vector<4x686xf32>
    %38 = vector.extract_strided_slice %2 {offsets = [0, 37], sizes = [4, 686], strides = [1, 1]} : vector<4x724xf32> to vector<4x686xf32>
    %39 = vector.extract_strided_slice %3 {offsets = [0, 7], sizes = [4, 1], strides = [1, 1]} : vector<4x9xf32> to vector<4x1xf32>
    %40 = vector.broadcast %39 : vector<4x1xf32> to vector<4x686xf32>
    %41 = arith.mulf %38, %40 : vector<4x686xf32>
    %42 = arith.addf %37, %41 : vector<4x686xf32>
    %43 = vector.extract_strided_slice %2 {offsets = [0, 38], sizes = [4, 686], strides = [1, 1]} : vector<4x724xf32> to vector<4x686xf32>
    %44 = vector.extract_strided_slice %3 {offsets = [0, 8], sizes = [4, 1], strides = [1, 1]} : vector<4x9xf32> to vector<4x1xf32>
    %45 = vector.broadcast %44 : vector<4x1xf32> to vector<4x686xf32>
    %46 = arith.mulf %43, %45 : vector<4x686xf32>
    %47 = arith.addf %42, %46 : vector<4x686xf32>
    %c0_3 = arith.constant 0 : index
    %c0_4 = arith.constant 0 : index
    %48 = vector.load %arg2[%c0_3, %c0_4] : memref<1x686xf32, #tpu.memory_space<vmem>>, vector<1x686xf32>
    %49 = vector.extract_strided_slice %47 {offsets = [0, 0], sizes = [1, 686], strides = [1, 1]} : vector<4x686xf32> to vector<1x686xf32>
    %50 = vector.extract_strided_slice %47 {offsets = [1, 0], sizes = [1, 686], strides = [1, 1]} : vector<4x686xf32> to vector<1x686xf32>
    %51 = vector.extract_strided_slice %47 {offsets = [2, 0], sizes = [1, 686], strides = [1, 1]} : vector<4x686xf32> to vector<1x686xf32>
    %52 = vector.extract_strided_slice %47 {offsets = [3, 0], sizes = [1, 686], strides = [1, 1]} : vector<4x686xf32> to vector<1x686xf32>
    %c0_5 = arith.constant 0 : index
    %c0_6 = arith.constant 0 : index
    %53 = memref.load %arg4[%c0_5, %c0_6] : memref<4x4xf32, #tpu.memory_space<smem>>
    %54 = vector.broadcast %53 : f32 to vector<1x686xf32>
    %55 = arith.mulf %49, %54 : vector<1x686xf32>
    %c1 = arith.constant 1 : index
    %c0_7 = arith.constant 0 : index
    %56 = memref.load %arg4[%c1, %c0_7] : memref<4x4xf32, #tpu.memory_space<smem>>
    %57 = vector.broadcast %56 : f32 to vector<1x686xf32>
    %58 = arith.mulf %50, %57 : vector<1x686xf32>
    %59 = arith.addf %55, %58 : vector<1x686xf32>
    %c2 = arith.constant 2 : index
    %c0_8 = arith.constant 0 : index
    %60 = memref.load %arg4[%c2, %c0_8] : memref<4x4xf32, #tpu.memory_space<smem>>
    %61 = vector.broadcast %60 : f32 to vector<1x686xf32>
    %62 = arith.mulf %51, %61 : vector<1x686xf32>
    %63 = arith.addf %59, %62 : vector<1x686xf32>
    %c3 = arith.constant 3 : index
    %c0_9 = arith.constant 0 : index
    %64 = memref.load %arg4[%c3, %c0_9] : memref<4x4xf32, #tpu.memory_space<smem>>
    %65 = vector.broadcast %64 : f32 to vector<1x686xf32>
    %66 = arith.mulf %52, %65 : vector<1x686xf32>
    %67 = arith.addf %63, %66 : vector<1x686xf32>
    %c0_10 = arith.constant 0 : index
    %68 = memref.load %arg5[%c0_10] : memref<4xf32, #tpu.memory_space<smem>>
    %69 = vector.broadcast %68 : f32 to vector<1x686xf32>
    %70 = arith.mulf %67, %69 : vector<1x686xf32>
    %c0_11 = arith.constant 0 : index
    %71 = memref.load %arg6[%c0_11] : memref<4xf32, #tpu.memory_space<smem>>
    %72 = vector.broadcast %71 : f32 to vector<1x686xf32>
    %73 = arith.addf %70, %72 : vector<1x686xf32>
    %cst_12 = arith.constant 0.000000e+00 : f32
    %74 = vector.broadcast %cst_12 : f32 to vector<1x686xf32>
    %75 = arith.maximumf %73, %74 : vector<1x686xf32>
    %76 = arith.mulf %75, %48 : vector<1x686xf32>
    %c0_13 = arith.constant 0 : index
    %c0_14 = arith.constant 0 : index
    %77 = vector.load %arg12[%c0_13, %c0_14] : memref<4x686xf32, #tpu.memory_space<vmem>>, vector<1x686xf32>
    tpu.vector_store %arg12[%c0_13, %c0_14], %76 {strides = array<i32>} : memref<4x686xf32, #tpu.memory_space<vmem>>, vector<1x686xf32>,
    %c0_15 = arith.constant 0 : index
    %c1_16 = arith.constant 1 : index
    %78 = memref.load %arg4[%c0_15, %c1_16] : memref<4x4xf32, #tpu.memory_space<smem>>
    %79 = vector.broadcast %78 : f32 to vector<1x686xf32>
    %80 = arith.mulf %49, %79 : vector<1x686xf32>
    %c1_17 = arith.constant 1 : index
    %c1_18 = arith.constant 1 : index
    %81 = memref.load %arg4[%c1_17, %c1_18] : memref<4x4xf32, #tpu.memory_space<smem>>
    %82 = vector.broadcast %81 : f32 to vector<1x686xf32>
    %83 = arith.mulf %50, %82 : vector<1x686xf32>
    %84 = arith.addf %80, %83 : vector<1x686xf32>
    %c2_19 = arith.constant 2 : index
    %c1_20 = arith.constant 1 : index
    %85 = memref.load %arg4[%c2_19, %c1_20] : memref<4x4xf32, #tpu.memory_space<smem>>
    %86 = vector.broadcast %85 : f32 to vector<1x686xf32>
    %87 = arith.mulf %51, %86 : vector<1x686xf32>
    %88 = arith.addf %84, %87 : vector<1x686xf32>
    %c3_21 = arith.constant 3 : index
    %c1_22 = arith.constant 1 : index
    %89 = memref.load %arg4[%c3_21, %c1_22] : memref<4x4xf32, #tpu.memory_space<smem>>
    %90 = vector.broadcast %89 : f32 to vector<1x686xf32>
    %91 = arith.mulf %52, %90 : vector<1x686xf32>
    %92 = arith.addf %88, %91 : vector<1x686xf32>
    %c1_23 = arith.constant 1 : index
    %93 = memref.load %arg5[%c1_23] : memref<4xf32, #tpu.memory_space<smem>>
    %94 = vector.broadcast %93 : f32 to vector<1x686xf32>
    %95 = arith.mulf %92, %94 : vector<1x686xf32>
    %c1_24 = arith.constant 1 : index
    %96 = memref.load %arg6[%c1_24] : memref<4xf32, #tpu.memory_space<smem>>
    %97 = vector.broadcast %96 : f32 to vector<1x686xf32>
    %98 = arith.addf %95, %97 : vector<1x686xf32>
    %cst_25 = arith.constant 0.000000e+00 : f32
    %99 = vector.broadcast %cst_25 : f32 to vector<1x686xf32>
    %100 = arith.maximumf %98, %99 : vector<1x686xf32>
    %101 = arith.mulf %100, %48 : vector<1x686xf32>
    %c1_26 = arith.constant 1 : index
    %c0_27 = arith.constant 0 : index
    %102 = vector.load %arg12[%c1_26, %c0_27] : memref<4x686xf32, #tpu.memory_space<vmem>>, vector<1x686xf32>
    tpu.vector_store %arg12[%c1_26, %c0_27], %101 {strides = array<i32>} : memref<4x686xf32, #tpu.memory_space<vmem>>, vector<1x686xf32>,
    %c0_28 = arith.constant 0 : index
    %c2_29 = arith.constant 2 : index
    %103 = memref.load %arg4[%c0_28, %c2_29] : memref<4x4xf32, #tpu.memory_space<smem>>
    %104 = vector.broadcast %103 : f32 to vector<1x686xf32>
    %105 = arith.mulf %49, %104 : vector<1x686xf32>
    %c1_30 = arith.constant 1 : index
    %c2_31 = arith.constant 2 : index
    %106 = memref.load %arg4[%c1_30, %c2_31] : memref<4x4xf32, #tpu.memory_space<smem>>
    %107 = vector.broadcast %106 : f32 to vector<1x686xf32>
    %108 = arith.mulf %50, %107 : vector<1x686xf32>
    %109 = arith.addf %105, %108 : vector<1x686xf32>
    %c2_32 = arith.constant 2 : index
    %c2_33 = arith.constant 2 : index
    %110 = memref.load %arg4[%c2_32, %c2_33] : memref<4x4xf32, #tpu.memory_space<smem>>
    %111 = vector.broadcast %110 : f32 to vector<1x686xf32>
    %112 = arith.mulf %51, %111 : vector<1x686xf32>
    %113 = arith.addf %109, %112 : vector<1x686xf32>
    %c3_34 = arith.constant 3 : index
    %c2_35 = arith.constant 2 : index
    %114 = memref.load %arg4[%c3_34, %c2_35] : memref<4x4xf32, #tpu.memory_space<smem>>
    %115 = vector.broadcast %114 : f32 to vector<1x686xf32>
    %116 = arith.mulf %52, %115 : vector<1x686xf32>
    %117 = arith.addf %113, %116 : vector<1x686xf32>
    %c2_36 = arith.constant 2 : index
    %118 = memref.load %arg5[%c2_36] : memref<4xf32, #tpu.memory_space<smem>>
    %119 = vector.broadcast %118 : f32 to vector<1x686xf32>
    %120 = arith.mulf %117, %119 : vector<1x686xf32>
    %c2_37 = arith.constant 2 : index
    %121 = memref.load %arg6[%c2_37] : memref<4xf32, #tpu.memory_space<smem>>
    %122 = vector.broadcast %121 : f32 to vector<1x686xf32>
    %123 = arith.addf %120, %122 : vector<1x686xf32>
    %cst_38 = arith.constant 0.000000e+00 : f32
    %124 = vector.broadcast %cst_38 : f32 to vector<1x686xf32>
    %125 = arith.maximumf %123, %124 : vector<1x686xf32>
    %126 = arith.mulf %125, %48 : vector<1x686xf32>
    %c2_39 = arith.constant 2 : index
    %c0_40 = arith.constant 0 : index
    %127 = vector.load %arg12[%c2_39, %c0_40] : memref<4x686xf32, #tpu.memory_space<vmem>>, vector<1x686xf32>
    tpu.vector_store %arg12[%c2_39, %c0_40], %126 {strides = array<i32>} : memref<4x686xf32, #tpu.memory_space<vmem>>, vector<1x686xf32>,
    %c0_41 = arith.constant 0 : index
    %c3_42 = arith.constant 3 : index
    %128 = memref.load %arg4[%c0_41, %c3_42] : memref<4x4xf32, #tpu.memory_space<smem>>
    %129 = vector.broadcast %128 : f32 to vector<1x686xf32>
    %130 = arith.mulf %49, %129 : vector<1x686xf32>
    %c1_43 = arith.constant 1 : index
    %c3_44 = arith.constant 3 : index
    %131 = memref.load %arg4[%c1_43, %c3_44] : memref<4x4xf32, #tpu.memory_space<smem>>
    %132 = vector.broadcast %131 : f32 to vector<1x686xf32>
    %133 = arith.mulf %50, %132 : vector<1x686xf32>
    %134 = arith.addf %130, %133 : vector<1x686xf32>
    %c2_45 = arith.constant 2 : index
    %c3_46 = arith.constant 3 : index
    %135 = memref.load %arg4[%c2_45, %c3_46] : memref<4x4xf32, #tpu.memory_space<smem>>
    %136 = vector.broadcast %135 : f32 to vector<1x686xf32>
    %137 = arith.mulf %51, %136 : vector<1x686xf32>
    %138 = arith.addf %134, %137 : vector<1x686xf32>
    %c3_47 = arith.constant 3 : index
    %c3_48 = arith.constant 3 : index
    %139 = memref.load %arg4[%c3_47, %c3_48] : memref<4x4xf32, #tpu.memory_space<smem>>
    %140 = vector.broadcast %139 : f32 to vector<1x686xf32>
    %141 = arith.mulf %52, %140 : vector<1x686xf32>
    %142 = arith.addf %138, %141 : vector<1x686xf32>
    %c3_49 = arith.constant 3 : index
    %143 = memref.load %arg5[%c3_49] : memref<4xf32, #tpu.memory_space<smem>>
    %144 = vector.broadcast %143 : f32 to vector<1x686xf32>
    %145 = arith.mulf %142, %144 : vector<1x686xf32>
    %c3_50 = arith.constant 3 : index
    %146 = memref.load %arg6[%c3_50] : memref<4xf32, #tpu.memory_space<smem>>
    %147 = vector.broadcast %146 : f32 to vector<1x686xf32>
    %148 = arith.addf %145, %147 : vector<1x686xf32>
    %cst_51 = arith.constant 0.000000e+00 : f32
    %149 = vector.broadcast %cst_51 : f32 to vector<1x686xf32>
    %150 = arith.maximumf %148, %149 : vector<1x686xf32>
    %151 = arith.mulf %150, %48 : vector<1x686xf32>
    %c3_52 = arith.constant 3 : index
    %c0_53 = arith.constant 0 : index
    %152 = vector.load %arg12[%c3_52, %c0_53] : memref<4x686xf32, #tpu.memory_space<vmem>>, vector<1x686xf32>
    tpu.vector_store %arg12[%c3_52, %c0_53], %151 {strides = array<i32>} : memref<4x686xf32, #tpu.memory_space<vmem>>, vector<1x686xf32>,
    %c0_54 = arith.constant 0 : index
    %c0_55 = arith.constant 0 : index
    %153 = vector.load %arg12[%c0_54, %c0_55] : memref<4x686xf32, #tpu.memory_space<vmem>>, vector<4x686xf32>
    %c0_56 = arith.constant 0 : index
    %c0_57 = arith.constant 0 : index
    %154 = vector.load %arg7[%c0_56, %c0_57] : memref<4x9xf32, #tpu.memory_space<vmem>>, vector<4x9xf32>
    %155 = vector.extract_strided_slice %153 {offsets = [0, 0], sizes = [4, 648], strides = [1, 1]} : vector<4x686xf32> to vector<4x648xf32>
    %156 = vector.extract_strided_slice %154 {offsets = [0, 0], sizes = [4, 1], strides = [1, 1]} : vector<4x9xf32> to vector<4x1xf32>
    %157 = vector.broadcast %156 : vector<4x1xf32> to vector<4x648xf32>
    %158 = arith.mulf %155, %157 : vector<4x648xf32>
    %159 = vector.extract_strided_slice %153 {offsets = [0, 1], sizes = [4, 648], strides = [1, 1]} : vector<4x686xf32> to vector<4x648xf32>
    %160 = vector.extract_strided_slice %154 {offsets = [0, 1], sizes = [4, 1], strides = [1, 1]} : vector<4x9xf32> to vector<4x1xf32>
    %161 = vector.broadcast %160 : vector<4x1xf32> to vector<4x648xf32>
    %162 = arith.mulf %159, %161 : vector<4x648xf32>
    %163 = arith.addf %158, %162 : vector<4x648xf32>
    %164 = vector.extract_strided_slice %153 {offsets = [0, 2], sizes = [4, 648], strides = [1, 1]} : vector<4x686xf32> to vector<4x648xf32>
    %165 = vector.extract_strided_slice %154 {offsets = [0, 2], sizes = [4, 1], strides = [1, 1]} : vector<4x9xf32> to vector<4x1xf32>
    %166 = vector.broadcast %165 : vector<4x1xf32> to vector<4x648xf32>
    %167 = arith.mulf %164, %166 : vector<4x648xf32>
    %168 = arith.addf %163, %167 : vector<4x648xf32>
    %169 = vector.extract_strided_slice %153 {offsets = [0, 18], sizes = [4, 648], strides = [1, 1]} : vector<4x686xf32> to vector<4x648xf32>
    %170 = vector.extract_strided_slice %154 {offsets = [0, 3], sizes = [4, 1], strides = [1, 1]} : vector<4x9xf32> to vector<4x1xf32>
    %171 = vector.broadcast %170 : vector<4x1xf32> to vector<4x648xf32>
    %172 = arith.mulf %169, %171 : vector<4x648xf32>
    %173 = arith.addf %168, %172 : vector<4x648xf32>
    %174 = vector.extract_strided_slice %153 {offsets = [0, 19], sizes = [4, 648], strides = [1, 1]} : vector<4x686xf32> to vector<4x648xf32>
    %175 = vector.extract_strided_slice %154 {offsets = [0, 4], sizes = [4, 1], strides = [1, 1]} : vector<4x9xf32> to vector<4x1xf32>
    %176 = vector.broadcast %175 : vector<4x1xf32> to vector<4x648xf32>
    %177 = arith.mulf %174, %176 : vector<4x648xf32>
    %178 = arith.addf %173, %177 : vector<4x648xf32>
    %179 = vector.extract_strided_slice %153 {offsets = [0, 20], sizes = [4, 648], strides = [1, 1]} : vector<4x686xf32> to vector<4x648xf32>
    %180 = vector.extract_strided_slice %154 {offsets = [0, 5], sizes = [4, 1], strides = [1, 1]} : vector<4x9xf32> to vector<4x1xf32>
    %181 = vector.broadcast %180 : vector<4x1xf32> to vector<4x648xf32>
    %182 = arith.mulf %179, %181 : vector<4x648xf32>
    %183 = arith.addf %178, %182 : vector<4x648xf32>
    %184 = vector.extract_strided_slice %153 {offsets = [0, 36], sizes = [4, 648], strides = [1, 1]} : vector<4x686xf32> to vector<4x648xf32>
    %185 = vector.extract_strided_slice %154 {offsets = [0, 6], sizes = [4, 1], strides = [1, 1]} : vector<4x9xf32> to vector<4x1xf32>
    %186 = vector.broadcast %185 : vector<4x1xf32> to vector<4x648xf32>
    %187 = arith.mulf %184, %186 : vector<4x648xf32>
    %188 = arith.addf %183, %187 : vector<4x648xf32>
    %189 = vector.extract_strided_slice %153 {offsets = [0, 37], sizes = [4, 648], strides = [1, 1]} : vector<4x686xf32> to vector<4x648xf32>
    %190 = vector.extract_strided_slice %154 {offsets = [0, 7], sizes = [4, 1], strides = [1, 1]} : vector<4x9xf32> to vector<4x1xf32>
    %191 = vector.broadcast %190 : vector<4x1xf32> to vector<4x648xf32>
    %192 = arith.mulf %189, %191 : vector<4x648xf32>
    %193 = arith.addf %188, %192 : vector<4x648xf32>
    %194 = vector.extract_strided_slice %153 {offsets = [0, 38], sizes = [4, 648], strides = [1, 1]} : vector<4x686xf32> to vector<4x648xf32>
    %195 = vector.extract_strided_slice %154 {offsets = [0, 8], sizes = [4, 1], strides = [1, 1]} : vector<4x9xf32> to vector<4x1xf32>
    %196 = vector.broadcast %195 : vector<4x1xf32> to vector<4x648xf32>
    %197 = arith.mulf %194, %196 : vector<4x648xf32>
    %198 = arith.addf %193, %197 : vector<4x648xf32>
    %199 = vector.extract_strided_slice %198 {offsets = [0, 0], sizes = [1, 648], strides = [1, 1]} : vector<4x648xf32> to vector<1x648xf32>
    %200 = vector.extract_strided_slice %198 {offsets = [1, 0], sizes = [1, 648], strides = [1, 1]} : vector<4x648xf32> to vector<1x648xf32>
    %201 = vector.extract_strided_slice %198 {offsets = [2, 0], sizes = [1, 648], strides = [1, 1]} : vector<4x648xf32> to vector<1x648xf32>
    %202 = vector.extract_strided_slice %198 {offsets = [3, 0], sizes = [1, 648], strides = [1, 1]} : vector<4x648xf32> to vector<1x648xf32>
    %c0_58 = arith.constant 0 : index
    %c0_59 = arith.constant 0 : index
    %203 = memref.load %arg8[%c0_58, %c0_59] : memref<4x8xf32, #tpu.memory_space<smem>>
    %204 = vector.broadcast %203 : f32 to vector<1x648xf32>
    %205 = arith.mulf %199, %204 : vector<1x648xf32>
    %c1_60 = arith.constant 1 : index
    %c0_61 = arith.constant 0 : index
    %206 = memref.load %arg8[%c1_60, %c0_61] : memref<4x8xf32, #tpu.memory_space<smem>>
    %207 = vector.broadcast %206 : f32 to vector<1x648xf32>
    %208 = arith.mulf %200, %207 : vector<1x648xf32>
    %209 = arith.addf %205, %208 : vector<1x648xf32>
    %c2_62 = arith.constant 2 : index
    %c0_63 = arith.constant 0 : index
    %210 = memref.load %arg8[%c2_62, %c0_63] : memref<4x8xf32, #tpu.memory_space<smem>>
    %211 = vector.broadcast %210 : f32 to vector<1x648xf32>
    %212 = arith.mulf %201, %211 : vector<1x648xf32>
    %213 = arith.addf %209, %212 : vector<1x648xf32>
    %c3_64 = arith.constant 3 : index
    %c0_65 = arith.constant 0 : index
    %214 = memref.load %arg8[%c3_64, %c0_65] : memref<4x8xf32, #tpu.memory_space<smem>>
    %215 = vector.broadcast %214 : f32 to vector<1x648xf32>
    %216 = arith.mulf %202, %215 : vector<1x648xf32>
    %217 = arith.addf %213, %216 : vector<1x648xf32>
    %c0_66 = arith.constant 0 : index
    %218 = memref.load %arg9[%c0_66] : memref<8xf32, #tpu.memory_space<smem>>
    %219 = vector.broadcast %218 : f32 to vector<1x648xf32>
    %220 = arith.mulf %217, %219 : vector<1x648xf32>
    %c0_67 = arith.constant 0 : index
    %221 = memref.load %arg10[%c0_67] : memref<8xf32, #tpu.memory_space<smem>>
    %222 = vector.broadcast %221 : f32 to vector<1x648xf32>
    %223 = arith.addf %220, %222 : vector<1x648xf32>
    %c0_68 = arith.constant 0 : index
    %c0_69 = arith.constant 0 : index
    %224 = vector.load %arg11[%c0_68, %c0_69] : memref<8x648xf32, #tpu.memory_space<vmem>>, vector<1x648xf32>
    tpu.vector_store %arg11[%c0_68, %c0_69], %223 {strides = array<i32>} : memref<8x648xf32, #tpu.memory_space<vmem>>, vector<1x648xf32>,
    %c0_70 = arith.constant 0 : index
    %c1_71 = arith.constant 1 : index
    %225 = memref.load %arg8[%c0_70, %c1_71] : memref<4x8xf32, #tpu.memory_space<smem>>
    %226 = vector.broadcast %225 : f32 to vector<1x648xf32>
    %227 = arith.mulf %199, %226 : vector<1x648xf32>
    %c1_72 = arith.constant 1 : index
    %c1_73 = arith.constant 1 : index
    %228 = memref.load %arg8[%c1_72, %c1_73] : memref<4x8xf32, #tpu.memory_space<smem>>
    %229 = vector.broadcast %228 : f32 to vector<1x648xf32>
    %230 = arith.mulf %200, %229 : vector<1x648xf32>
    %231 = arith.addf %227, %230 : vector<1x648xf32>
    %c2_74 = arith.constant 2 : index
    %c1_75 = arith.constant 1 : index
    %232 = memref.load %arg8[%c2_74, %c1_75] : memref<4x8xf32, #tpu.memory_space<smem>>
    %233 = vector.broadcast %232 : f32 to vector<1x648xf32>
    %234 = arith.mulf %201, %233 : vector<1x648xf32>
    %235 = arith.addf %231, %234 : vector<1x648xf32>
    %c3_76 = arith.constant 3 : index
    %c1_77 = arith.constant 1 : index
    %236 = memref.load %arg8[%c3_76, %c1_77] : memref<4x8xf32, #tpu.memory_space<smem>>
    %237 = vector.broadcast %236 : f32 to vector<1x648xf32>
    %238 = arith.mulf %202, %237 : vector<1x648xf32>
    %239 = arith.addf %235, %238 : vector<1x648xf32>
    %c1_78 = arith.constant 1 : index
    %240 = memref.load %arg9[%c1_78] : memref<8xf32, #tpu.memory_space<smem>>
    %241 = vector.broadcast %240 : f32 to vector<1x648xf32>
    %242 = arith.mulf %239, %241 : vector<1x648xf32>
    %c1_79 = arith.constant 1 : index
    %243 = memref.load %arg10[%c1_79] : memref<8xf32, #tpu.memory_space<smem>>
    %244 = vector.broadcast %243 : f32 to vector<1x648xf32>
    %245 = arith.addf %242, %244 : vector<1x648xf32>
    %c1_80 = arith.constant 1 : index
    %c0_81 = arith.constant 0 : index
    %246 = vector.load %arg11[%c1_80, %c0_81] : memref<8x648xf32, #tpu.memory_space<vmem>>, vector<1x648xf32>
    tpu.vector_store %arg11[%c1_80, %c0_81], %245 {strides = array<i32>} : memref<8x648xf32, #tpu.memory_space<vmem>>, vector<1x648xf32>,
    %c0_82 = arith.constant 0 : index
    %c2_83 = arith.constant 2 : index
    %247 = memref.load %arg8[%c0_82, %c2_83] : memref<4x8xf32, #tpu.memory_space<smem>>
    %248 = vector.broadcast %247 : f32 to vector<1x648xf32>
    %249 = arith.mulf %199, %248 : vector<1x648xf32>
    %c1_84 = arith.constant 1 : index
    %c2_85 = arith.constant 2 : index
    %250 = memref.load %arg8[%c1_84, %c2_85] : memref<4x8xf32, #tpu.memory_space<smem>>
    %251 = vector.broadcast %250 : f32 to vector<1x648xf32>
    %252 = arith.mulf %200, %251 : vector<1x648xf32>
    %253 = arith.addf %249, %252 : vector<1x648xf32>
    %c2_86 = arith.constant 2 : index
    %c2_87 = arith.constant 2 : index
    %254 = memref.load %arg8[%c2_86, %c2_87] : memref<4x8xf32, #tpu.memory_space<smem>>
    %255 = vector.broadcast %254 : f32 to vector<1x648xf32>
    %256 = arith.mulf %201, %255 : vector<1x648xf32>
    %257 = arith.addf %253, %256 : vector<1x648xf32>
    %c3_88 = arith.constant 3 : index
    %c2_89 = arith.constant 2 : index
    %258 = memref.load %arg8[%c3_88, %c2_89] : memref<4x8xf32, #tpu.memory_space<smem>>
    %259 = vector.broadcast %258 : f32 to vector<1x648xf32>
    %260 = arith.mulf %202, %259 : vector<1x648xf32>
    %261 = arith.addf %257, %260 : vector<1x648xf32>
    %c2_90 = arith.constant 2 : index
    %262 = memref.load %arg9[%c2_90] : memref<8xf32, #tpu.memory_space<smem>>
    %263 = vector.broadcast %262 : f32 to vector<1x648xf32>
    %264 = arith.mulf %261, %263 : vector<1x648xf32>
    %c2_91 = arith.constant 2 : index
    %265 = memref.load %arg10[%c2_91] : memref<8xf32, #tpu.memory_space<smem>>
    %266 = vector.broadcast %265 : f32 to vector<1x648xf32>
    %267 = arith.addf %264, %266 : vector<1x648xf32>
    %c2_92 = arith.constant 2 : index
    %c0_93 = arith.constant 0 : index
    %268 = vector.load %arg11[%c2_92, %c0_93] : memref<8x648xf32, #tpu.memory_space<vmem>>, vector<1x648xf32>
    tpu.vector_store %arg11[%c2_92, %c0_93], %267 {strides = array<i32>} : memref<8x648xf32, #tpu.memory_space<vmem>>, vector<1x648xf32>,
    %c0_94 = arith.constant 0 : index
    %c3_95 = arith.constant 3 : index
    %269 = memref.load %arg8[%c0_94, %c3_95] : memref<4x8xf32, #tpu.memory_space<smem>>
    %270 = vector.broadcast %269 : f32 to vector<1x648xf32>
    %271 = arith.mulf %199, %270 : vector<1x648xf32>
    %c1_96 = arith.constant 1 : index
    %c3_97 = arith.constant 3 : index
    %272 = memref.load %arg8[%c1_96, %c3_97] : memref<4x8xf32, #tpu.memory_space<smem>>
    %273 = vector.broadcast %272 : f32 to vector<1x648xf32>
    %274 = arith.mulf %200, %273 : vector<1x648xf32>
    %275 = arith.addf %271, %274 : vector<1x648xf32>
    %c2_98 = arith.constant 2 : index
    %c3_99 = arith.constant 3 : index
    %276 = memref.load %arg8[%c2_98, %c3_99] : memref<4x8xf32, #tpu.memory_space<smem>>
    %277 = vector.broadcast %276 : f32 to vector<1x648xf32>
    %278 = arith.mulf %201, %277 : vector<1x648xf32>
    %279 = arith.addf %275, %278 : vector<1x648xf32>
    %c3_100 = arith.constant 3 : index
    %c3_101 = arith.constant 3 : index
    %280 = memref.load %arg8[%c3_100, %c3_101] : memref<4x8xf32, #tpu.memory_space<smem>>
    %281 = vector.broadcast %280 : f32 to vector<1x648xf32>
    %282 = arith.mulf %202, %281 : vector<1x648xf32>
    %283 = arith.addf %279, %282 : vector<1x648xf32>
    %c3_102 = arith.constant 3 : index
    %284 = memref.load %arg9[%c3_102] : memref<8xf32, #tpu.memory_space<smem>>
    %285 = vector.broadcast %284 : f32 to vector<1x648xf32>
    %286 = arith.mulf %283, %285 : vector<1x648xf32>
    %c3_103 = arith.constant 3 : index
    %287 = memref.load %arg10[%c3_103] : memref<8xf32, #tpu.memory_space<smem>>
    %288 = vector.broadcast %287 : f32 to vector<1x648xf32>
    %289 = arith.addf %286, %288 : vector<1x648xf32>
    %c3_104 = arith.constant 3 : index
    %c0_105 = arith.constant 0 : index
    %290 = vector.load %arg11[%c3_104, %c0_105] : memref<8x648xf32, #tpu.memory_space<vmem>>, vector<1x648xf32>
    tpu.vector_store %arg11[%c3_104, %c0_105], %289 {strides = array<i32>} : memref<8x648xf32, #tpu.memory_space<vmem>>, vector<1x648xf32>,
    %c0_106 = arith.constant 0 : index
    %c4 = arith.constant 4 : index
    %291 = memref.load %arg8[%c0_106, %c4] : memref<4x8xf32, #tpu.memory_space<smem>>
    %292 = vector.broadcast %291 : f32 to vector<1x648xf32>
    %293 = arith.mulf %199, %292 : vector<1x648xf32>
    %c1_107 = arith.constant 1 : index
    %c4_108 = arith.constant 4 : index
    %294 = memref.load %arg8[%c1_107, %c4_108] : memref<4x8xf32, #tpu.memory_space<smem>>
    %295 = vector.broadcast %294 : f32 to vector<1x648xf32>
    %296 = arith.mulf %200, %295 : vector<1x648xf32>
    %297 = arith.addf %293, %296 : vector<1x648xf32>
    %c2_109 = arith.constant 2 : index
    %c4_110 = arith.constant 4 : index
    %298 = memref.load %arg8[%c2_109, %c4_110] : memref<4x8xf32, #tpu.memory_space<smem>>
    %299 = vector.broadcast %298 : f32 to vector<1x648xf32>
    %300 = arith.mulf %201, %299 : vector<1x648xf32>
    %301 = arith.addf %297, %300 : vector<1x648xf32>
    %c3_111 = arith.constant 3 : index
    %c4_112 = arith.constant 4 : index
    %302 = memref.load %arg8[%c3_111, %c4_112] : memref<4x8xf32, #tpu.memory_space<smem>>
    %303 = vector.broadcast %302 : f32 to vector<1x648xf32>
    %304 = arith.mulf %202, %303 : vector<1x648xf32>
    %305 = arith.addf %301, %304 : vector<1x648xf32>
    %c4_113 = arith.constant 4 : index
    %306 = memref.load %arg9[%c4_113] : memref<8xf32, #tpu.memory_space<smem>>
    %307 = vector.broadcast %306 : f32 to vector<1x648xf32>
    %308 = arith.mulf %305, %307 : vector<1x648xf32>
    %c4_114 = arith.constant 4 : index
    %309 = memref.load %arg10[%c4_114] : memref<8xf32, #tpu.memory_space<smem>>
    %310 = vector.broadcast %309 : f32 to vector<1x648xf32>
    %311 = arith.addf %308, %310 : vector<1x648xf32>
    %c4_115 = arith.constant 4 : index
    %c0_116 = arith.constant 0 : index
    %312 = vector.load %arg11[%c4_115, %c0_116] : memref<8x648xf32, #tpu.memory_space<vmem>>, vector<1x648xf32>
    tpu.vector_store %arg11[%c4_115, %c0_116], %311 {strides = array<i32>} : memref<8x648xf32, #tpu.memory_space<vmem>>, vector<1x648xf32>,
    %c0_117 = arith.constant 0 : index
    %c5 = arith.constant 5 : index
    %313 = memref.load %arg8[%c0_117, %c5] : memref<4x8xf32, #tpu.memory_space<smem>>
    %314 = vector.broadcast %313 : f32 to vector<1x648xf32>
    %315 = arith.mulf %199, %314 : vector<1x648xf32>
    %c1_118 = arith.constant 1 : index
    %c5_119 = arith.constant 5 : index
    %316 = memref.load %arg8[%c1_118, %c5_119] : memref<4x8xf32, #tpu.memory_space<smem>>
    %317 = vector.broadcast %316 : f32 to vector<1x648xf32>
    %318 = arith.mulf %200, %317 : vector<1x648xf32>
    %319 = arith.addf %315, %318 : vector<1x648xf32>
    %c2_120 = arith.constant 2 : index
    %c5_121 = arith.constant 5 : index
    %320 = memref.load %arg8[%c2_120, %c5_121] : memref<4x8xf32, #tpu.memory_space<smem>>
    %321 = vector.broadcast %320 : f32 to vector<1x648xf32>
    %322 = arith.mulf %201, %321 : vector<1x648xf32>
    %323 = arith.addf %319, %322 : vector<1x648xf32>
    %c3_122 = arith.constant 3 : index
    %c5_123 = arith.constant 5 : index
    %324 = memref.load %arg8[%c3_122, %c5_123] : memref<4x8xf32, #tpu.memory_space<smem>>
    %325 = vector.broadcast %324 : f32 to vector<1x648xf32>
    %326 = arith.mulf %202, %325 : vector<1x648xf32>
    %327 = arith.addf %323, %326 : vector<1x648xf32>
    %c5_124 = arith.constant 5 : index
    %328 = memref.load %arg9[%c5_124] : memref<8xf32, #tpu.memory_space<smem>>
    %329 = vector.broadcast %328 : f32 to vector<1x648xf32>
    %330 = arith.mulf %327, %329 : vector<1x648xf32>
    %c5_125 = arith.constant 5 : index
    %331 = memref.load %arg10[%c5_125] : memref<8xf32, #tpu.memory_space<smem>>
    %332 = vector.broadcast %331 : f32 to vector<1x648xf32>
    %333 = arith.addf %330, %332 : vector<1x648xf32>
    %c5_126 = arith.constant 5 : index
    %c0_127 = arith.constant 0 : index
    %334 = vector.load %arg11[%c5_126, %c0_127] : memref<8x648xf32, #tpu.memory_space<vmem>>, vector<1x648xf32>
    tpu.vector_store %arg11[%c5_126, %c0_127], %333 {strides = array<i32>} : memref<8x648xf32, #tpu.memory_space<vmem>>, vector<1x648xf32>,
    %c0_128 = arith.constant 0 : index
    %c6 = arith.constant 6 : index
    %335 = memref.load %arg8[%c0_128, %c6] : memref<4x8xf32, #tpu.memory_space<smem>>
    %336 = vector.broadcast %335 : f32 to vector<1x648xf32>
    %337 = arith.mulf %199, %336 : vector<1x648xf32>
    %c1_129 = arith.constant 1 : index
    %c6_130 = arith.constant 6 : index
    %338 = memref.load %arg8[%c1_129, %c6_130] : memref<4x8xf32, #tpu.memory_space<smem>>
    %339 = vector.broadcast %338 : f32 to vector<1x648xf32>
    %340 = arith.mulf %200, %339 : vector<1x648xf32>
    %341 = arith.addf %337, %340 : vector<1x648xf32>
    %c2_131 = arith.constant 2 : index
    %c6_132 = arith.constant 6 : index
    %342 = memref.load %arg8[%c2_131, %c6_132] : memref<4x8xf32, #tpu.memory_space<smem>>
    %343 = vector.broadcast %342 : f32 to vector<1x648xf32>
    %344 = arith.mulf %201, %343 : vector<1x648xf32>
    %345 = arith.addf %341, %344 : vector<1x648xf32>
    %c3_133 = arith.constant 3 : index
    %c6_134 = arith.constant 6 : index
    %346 = memref.load %arg8[%c3_133, %c6_134] : memref<4x8xf32, #tpu.memory_space<smem>>
    %347 = vector.broadcast %346 : f32 to vector<1x648xf32>
    %348 = arith.mulf %202, %347 : vector<1x648xf32>
    %349 = arith.addf %345, %348 : vector<1x648xf32>
    %c6_135 = arith.constant 6 : index
    %350 = memref.load %arg9[%c6_135] : memref<8xf32, #tpu.memory_space<smem>>
    %351 = vector.broadcast %350 : f32 to vector<1x648xf32>
    %352 = arith.mulf %349, %351 : vector<1x648xf32>
    %c6_136 = arith.constant 6 : index
    %353 = memref.load %arg10[%c6_136] : memref<8xf32, #tpu.memory_space<smem>>
    %354 = vector.broadcast %353 : f32 to vector<1x648xf32>
    %355 = arith.addf %352, %354 : vector<1x648xf32>
    %c6_137 = arith.constant 6 : index
    %c0_138 = arith.constant 0 : index
    %356 = vector.load %arg11[%c6_137, %c0_138] : memref<8x648xf32, #tpu.memory_space<vmem>>, vector<1x648xf32>
    tpu.vector_store %arg11[%c6_137, %c0_138], %355 {strides = array<i32>} : memref<8x648xf32, #tpu.memory_space<vmem>>, vector<1x648xf32>,
    %c0_139 = arith.constant 0 : index
    %c7 = arith.constant 7 : index
    %357 = memref.load %arg8[%c0_139, %c7] : memref<4x8xf32, #tpu.memory_space<smem>>
    %358 = vector.broadcast %357 : f32 to vector<1x648xf32>
    %359 = arith.mulf %199, %358 : vector<1x648xf32>
    %c1_140 = arith.constant 1 : index
    %c7_141 = arith.constant 7 : index
    %360 = memref.load %arg8[%c1_140, %c7_141] : memref<4x8xf32, #tpu.memory_space<smem>>
    %361 = vector.broadcast %360 : f32 to vector<1x648xf32>
    %362 = arith.mulf %200, %361 : vector<1x648xf32>
    %363 = arith.addf %359, %362 : vector<1x648xf32>
    %c2_142 = arith.constant 2 : index
    %c7_143 = arith.constant 7 : index
    %364 = memref.load %arg8[%c2_142, %c7_143] : memref<4x8xf32, #tpu.memory_space<smem>>
    %365 = vector.broadcast %364 : f32 to vector<1x648xf32>
    %366 = arith.mulf %201, %365 : vector<1x648xf32>
    %367 = arith.addf %363, %366 : vector<1x648xf32>
    %c3_144 = arith.constant 3 : index
    %c7_145 = arith.constant 7 : index
    %368 = memref.load %arg8[%c3_144, %c7_145] : memref<4x8xf32, #tpu.memory_space<smem>>
    %369 = vector.broadcast %368 : f32 to vector<1x648xf32>
    %370 = arith.mulf %202, %369 : vector<1x648xf32>
    %371 = arith.addf %367, %370 : vector<1x648xf32>
    %c7_146 = arith.constant 7 : index
    %372 = memref.load %arg9[%c7_146] : memref<8xf32, #tpu.memory_space<smem>>
    %373 = vector.broadcast %372 : f32 to vector<1x648xf32>
    %374 = arith.mulf %371, %373 : vector<1x648xf32>
    %c7_147 = arith.constant 7 : index
    %375 = memref.load %arg10[%c7_147] : memref<8xf32, #tpu.memory_space<smem>>
    %376 = vector.broadcast %375 : f32 to vector<1x648xf32>
    %377 = arith.addf %374, %376 : vector<1x648xf32>
    %c7_148 = arith.constant 7 : index
    %c0_149 = arith.constant 0 : index
    %378 = vector.load %arg11[%c7_148, %c0_149] : memref<8x648xf32, #tpu.memory_space<vmem>>, vector<1x648xf32>
    tpu.vector_store %arg11[%c7_148, %c0_149], %377 {strides = array<i32>} : memref<8x648xf32, #tpu.memory_space<vmem>>, vector<1x648xf32>,
    return
  }
  func.func @transform_0(%arg0: i32) -> (i32, i32) {
    %c0_i32 = arith.constant 0 : i32
    %c0_i32_0 = arith.constant 0 : i32
    %c0_i32_1 = arith.constant 0 : i32
    return %c0_i32, %c0_i32_0 : i32, i32
  }
  func.func @transform_1(%arg0: i32) -> (i32, i32) {
    %c0_i32 = arith.constant 0 : i32
    %c0_i32_0 = arith.constant 0 : i32
    %c0_i32_1 = arith.constant 0 : i32
    return %c0_i32, %c0_i32_0 : i32, i32
  }
  func.func @transform_2(%arg0: i32) -> (i32, i32) {
    %c0_i32 = arith.constant 0 : i32
    %c0_i32_0 = arith.constant 0 : i32
    %c0_i32_1 = arith.constant 0 : i32
    return %c0_i32, %c0_i32_0 : i32, i32
  }
  func.func @transform_3(%arg0: i32) -> (i32, i32) {
    %c0_i32 = arith.constant 0 : i32
    %c0_i32_0 = arith.constant 0 : i32
    %c0_i32_1 = arith.constant 0 : i32
    return %c0_i32, %c0_i32_0 : i32, i32
  }
  func.func @transform_4(%arg0: i32) -> i32 {
    %c0_i32 = arith.constant 0 : i32
    %c0_i32_0 = arith.constant 0 : i32
    return %c0_i32 : i32
  }
  func.func @transform_5(%arg0: i32) -> i32 {
    %c0_i32 = arith.constant 0 : i32
    %c0_i32_0 = arith.constant 0 : i32
    return %c0_i32 : i32
  }
  func.func @transform_6(%arg0: i32) -> (i32, i32) {
    %c0_i32 = arith.constant 0 : i32
    %c0_i32_0 = arith.constant 0 : i32
    %c0_i32_1 = arith.constant 0 : i32
    return %c0_i32, %c0_i32_0 : i32, i32
  }
  func.func @transform_7(%arg0: i32) -> (i32, i32) {
    %c0_i32 = arith.constant 0 : i32
    %c0_i32_0 = arith.constant 0 : i32
    %c0_i32_1 = arith.constant 0 : i32
    return %c0_i32, %c0_i32_0 : i32, i32
  }
  func.func @transform_8(%arg0: i32) -> i32 {
    %c0_i32 = arith.constant 0 : i32
    %c0_i32_0 = arith.constant 0 : i32
    return %c0_i32 : i32
  }
  func.func @transform_9(%arg0: i32) -> i32 {
    %c0_i32 = arith.constant 0 : i32
    %c0_i32_0 = arith.constant 0 : i32
    return %c0_i32 : i32
  }
  func.func @transform_10(%arg0: i32) -> (i32, i32) {
    %c0_i32 = arith.constant 0 : i32
    %c0_i32_0 = arith.constant 0 : i32
    %c0_i32_1 = arith.constant 0 : i32
    return %c0_i32, %c0_i32_0 : i32, i32
  }
}

</mosaic_0001>

<bundles_post_ra>
// kernel: tpu_custom_call.1
= control target key start
LH: loop header
LB: loop body
LE: loop exit
PB: predicated region body
PF: predicated region fallthrough
CT: control target
= control target key end

     0   :  { %s4038_s0 = inlined_call_operand.hbm [shape: f32[4,724], index: 0, kind: input, shape index: {}]   ;;  %s4039_s1 = inlined_call_operand.hbm [shape: f32[1,686], index: 1, kind: input, shape index: {}]   ;;  %s4040_s2 = inlined_call_operand.hbm [shape: f32[4,9], index: 2, kind: input, shape index: {}]   ;;  %s4041_s3 = inlined_call_operand.vmem [shape: f32[4,4], index: 3, kind: input, shape index: {}]   ;;  %s4042_s4 = inlined_call_operand.hbm [shape: f32[4], index: 4, kind: input, shape index: {}]   ;;  %s4043_s5 = inlined_call_operand.hbm [shape: f32[4], index: 5, kind: input, shape index: {}]   ;;  %s4044_s6 = inlined_call_operand.vmem [shape: f32[4,9], index: 6, kind: input, shape index: {}]   ;;  %s4045_s7 = inlined_call_operand.vmem [shape: f32[4,8], index: 7, kind: input, shape index: {}]   ;;  %s4046_s8 = inlined_call_operand.vmem [shape: f32[8], index: 8, kind: input, shape index: {}]   ;;  %s4047_s9 = inlined_call_operand.vmem [shape: f32[8], index: 9, kind: input, shape index: {}]   ;;  %s4048_s10 = inlined_call_operand.hbm [shape: f32[8,648], index: 10, kind: output, shape index: {}]  }
   0x1   :  { %4061 = sst [smem:[#allocation43_spill]] %s4048_s10 }
   0x2   :  { %15 = vsyncpa [#allocation4], 0 }
   0x3   :  { %16 = vsyncpa [#allocation9], 0 }
   0x4   :  { %17 = vsyncpa [#allocation7], 0 }
   0x5   :  { %18 = vsyncpa [#allocation6], 0 }
   0x6   :  { %19 = vsyncpa [#allocation14], 0 }
   0x7   :  { %20 = vsyncpa [#allocation16], 0 }
   0x8   :  { %21 = vsyncpa [#allocation19], 0  ;;  %s87_s15 = sshll.u32 %s4045_s7, 4  ;;  %s88_s15 = int_to_ptr.vmem [resolvable:$true] %s87_s15 }
   0x9   :  { %22 = vsyncpa [#allocation5], 0  ;;  %s2665_s16 = smov [#allocation8]  }
   0xa   :  { %s39_s17 = sshll.u32 %s2665_s16, 4  ;;  %s40_s17 = int_to_ptr.vmem [resolvable:$true] %s39_s17 }
   0xb   :  { %s2513_s18 = scalar_lea.vmem %s40_s17, 96  ;;  %p2518_p1 = scmp.lt.s32.totalorder %s40_s17, %s40_s17 }
   0xc   :  { %p2514_p0 = scmp.ne.s32.totalorder %s40_s17, %s2513_s18  ;;  %p2519_p2 = scmp.lt.s32.totalorder %s2513_s18, %s2513_s18 }
   0xe   :  { %p2520_p3 = por %p2519_p2, %p2518_p1 }
  0x10   :  { %p2521_p4 = pnand %p2520_p3, %p2514_p0 }
  0x12   :  { %2524 = shalt.err (!%p2521_p4)
}
  0x13   :  { %42 = dma.hbm_to_vmem [thread:$0]  %s4039_s1, 96, %s40_s17, [#allocation9]  }
  0x14   :  { %s2525_s21 = scalar_lea.vmem %s88_s15, 64  ;;  %p2530_p6 = scmp.lt.s32.totalorder %s88_s15, %s88_s15 }
  0x15   :  { %p2526_p5 = scmp.ne.s32.totalorder %s88_s15, %s2525_s21  ;;  %p2531_p7 = scmp.lt.s32.totalorder %s2525_s21, %s2525_s21 }
  0x17   :  { %p2532_p8 = por %p2531_p7, %p2530_p6 }
  0x19   :  { %p2533_p9 = pnand %p2532_p8, %p2526_p5 }
  0x1b   :  { %2536 = shalt.err (!%p2533_p9)
}
  0x1c   :  { %s2666_s7 = smov [#allocation15]   ;;  %s2667_s22 = smov [#allocation3]  }
  0x1d   :  { %90 = dma.vmem_to_smem %s88_s15, 64, %s2666_s7, [#allocation16]  }
  0x1e   :  { %s29_s23 = sshll.u32 %s2667_s22, 4  ;;  %s2668_s24 = smov [#allocation10]   ;;  %s30_s23 = int_to_ptr.vmem [resolvable:$true] %s29_s23 }
  0x1f   :  { %s49_s25 = sshll.u32 %s2668_s24, 4  ;;  %s2545_s26 = scalar_lea.vmem %s30_s23, 384  ;;  %s50_s25 = int_to_ptr.vmem [resolvable:$true] %s49_s25 }
  0x20   :  { %p2546_p10 = scmp.ne.s32.totalorder %s30_s23, %s2545_s26  ;;  %p2550_p11 = scmp.lt.s32.totalorder %s30_s23, %s30_s23 }
  0x21   :  { %p2551_p12 = scmp.lt.s32.totalorder %s2545_s26, %s2545_s26 }
  0x23   :  { %p2552_p13 = por %p2551_p12, %p2550_p11 }
  0x25   :  { %p2553_p0 = pnand %p2552_p13, %p2546_p10 }
  0x27   :  { %2556 = shalt.err (!%p2553_p0)
}
  0x28   :  { %32 = dma.hbm_to_vmem [thread:$0]  %s4038_s0, 384, %s30_s23, [#allocation4]  }
  0x29   :  { %s2565_s28 = scalar_lea.vmem %s50_s25, 64  ;;  %p2570_p2 = scmp.lt.s32.totalorder %s50_s25, %s50_s25 }
  0x2a   :  { %p2566_p1 = scmp.ne.s32.totalorder %s50_s25, %s2565_s28  ;;  %p2571_p3 = scmp.lt.s32.totalorder %s2565_s28, %s2565_s28 }
  0x2c   :  { %p2572_p4 = por %p2571_p3, %p2570_p2 }
  0x2e   :  { %p2573_p5 = pnand %p2572_p4, %p2566_p1 }
  0x30   :  { %2576 = shalt.err (!%p2573_p5)
}
  0x31   :  { %52 = dma.hbm_to_vmem [thread:$0]  %s4040_s2, 64, %s50_s25, [#allocation9]  }
  0x32   :  { %s59_s13 = sshll.u32 %s4041_s3, 4  ;;  %s60_s13 = int_to_ptr.vmem [resolvable:$true] %s59_s13 }
  0x33   :  { %s2577_s14 = scalar_lea.vmem %s60_s13, 64  ;;  %p2582_p7 = scmp.lt.s32.totalorder %s60_s13, %s60_s13 }
  0x34   :  { %p2578_p6 = scmp.ne.s32.totalorder %s60_s13, %s2577_s14  ;;  %p2583_p8 = scmp.lt.s32.totalorder %s2577_s14, %s2577_s14 }
  0x36   :  { %p2584_p9 = por %p2583_p8, %p2582_p7 }
  0x38   :  { %p2585_p10 = pnand %p2584_p9, %p2578_p6 }
  0x3a   :  { %2588 = shalt.err (!%p2585_p10)
}
  0x3b   :  { %s2669_s0 = smov [#allocation11]   ;;  %s2670_s15 = smov [#allocation12]  }
  0x3c   :  { %62 = dma.vmem_to_smem %s60_s13, 64, %s2669_s0, [#allocation7]  }
  0x3d   :  { %70 = dma.hbm_to_smem %s4042_s4, 16, %s2670_s15, [#allocation6]  }
  0x3e   :  { %s97_s19 = sshll.u32 %s4046_s8, 4  ;;  %s2671_s3 = smov [#allocation13]   ;;  %s98_s19 = int_to_ptr.vmem [resolvable:$true] %s97_s19 }
  0x3f   :  { %78 = dma.hbm_to_smem %s4043_s5, 16, %s2671_s3, [#allocation14]  }
  0x40   :  { %s2605_s7 = scalar_lea.vmem %s98_s19, 16  ;;  %p2610_p12 = scmp.lt.s32.totalorder %s98_s19, %s98_s19 }
  0x41   :  { %p2606_p11 = scmp.ne.s32.totalorder %s98_s19, %s2605_s7  ;;  %p2611_p13 = scmp.lt.s32.totalorder %s2605_s7, %s2605_s7 }
  0x43   :  { %p2612_p0 = por %p2611_p13, %p2610_p12 }
  0x45   :  { %p2613_p1 = pnand %p2612_p0, %p2606_p11 }
  0x47   :  { %2616 = shalt.err (!%p2613_p1)
}
  0x48   :  { %s2672_s22 = smov [#allocation17]   ;;  %s107_s24 = sshll.u32 %s4047_s9, 4  ;;  %s108_s24 = int_to_ptr.vmem [resolvable:$true] %s107_s24 }
  0x49   :  { %100 = dma.vmem_to_smem %s98_s19, 16, %s2672_s22, [#allocation16]  }
  0x4a   :  { %s2617_s8 = scalar_lea.vmem %s108_s24, 16  ;;  %p2622_p3 = scmp.lt.s32.totalorder %s108_s24, %s108_s24 }
  0x4b   :  { %p2618_p2 = scmp.ne.s32.totalorder %s108_s24, %s2617_s8  ;;  %p2623_p4 = scmp.lt.s32.totalorder %s2617_s8, %s2617_s8 }
  0x4d   :  { %p2624_p5 = por %p2623_p4, %p2622_p3 }
  0x4f   :  { %p2625_p6 = pnand %p2624_p5, %p2618_p2 }
  0x51   :  { %2628 = shalt.err (!%p2625_p6)
}
  0x52   :  { %s2673_s5 = smov [#allocation18]  }
  0x53   :  { %110 = dma.vmem_to_smem %s108_s24, 16, %s2673_s5, [#allocation19]  }
  0x54   :  { %2649 = dma.done.wait [#allocation4], 384  }
  0x55   :  { %2650 = vsyncadd [#allocation4], 4294966912 }
  0x56   :  { %2651 = dma.done.wait [#allocation9], 160  }
  0x57   :  { %2652 = vsyncadd [#allocation9], 4294967136 }
  0x58   :  { %2653 = dma.done.wait [#allocation7], 64  }
  0x59   :  { %2654 = vsyncadd [#allocation7], 4294967232 }
  0x5a   :  { %2655 = dma.done.wait [#allocation6], 16  }
  0x5b   :  { %2656 = vsyncadd [#allocation6], 4294967280 }
  0x5c   :  { %2657 = dma.done.wait [#allocation14], 16  }
  0x5d   :  { %2658 = vsyncadd [#allocation14], 4294967280 }
  0x5e   :  { %2659 = dma.done.wait [#allocation16], 80  }
  0x5f   :  { %2660 = vsyncadd [#allocation16], 4294967216 }
  0x60   :  { %2661 = dma.done.wait [#allocation19], 16  }
  0x61   :  { %2662 = vsyncadd [#allocation19], 4294967280 }
  0x62   :  { %138 = sfence }
  0x63   :  { %v145_v0 = vld [vmem:[#allocation10] sm:$0xf]  ;;  %v2674_v1 = vmov 1   ;;  %v2675_v2 = vmov 3   ;;  %v2676_v3 = vmov 2   ;;  %v2677_v4 = vmov 4  }
  0x64   :  { %2486 = vset.pattern.permute.xlu0 %v2674_v1  ;;  %2488 = vset.pattern.permute.xlu1 %v2675_v2  ;;  %v2678_v5 = vmov 5   ;;  %v2679_v6 = vmov 6   ;;  %v2680_v7 = vmov 7   ;;  %v2681_v8 = vmov 0   ;;  %v141_v15 = vld [vmem:[#allocation3 + $0x10] sm:$0xff]  ;;  %v139_v16 = vld [vmem:[#allocation3] sm:$0xff] }
  0x65   :  { %162 = vperm.xlu0 %2486, %v145_v0   ;;  %239 = vperm.xlu1 %2488, %v145_v0   ;;  %v2682_v9 = vmov 8   ;;  %v2683_v10 = vmov 839922192   ;;  %v4049_v12 = vlaneseq  ;;  %v2792_v18 = vmax.f32 %v141_v15, 0.0  ;;  %v140_v21 = vld [vmem:[#allocation3 + $0x8] sm:$0xff]  ;;  %s2684_s9 = smov 127  }
  0x66   :  { %v151_v11 = vunpack.c.l.s4 %v2683_v10  ;;  %v2794_v19 = vmax.f32 %v139_v16, 0.0  ;;  %v2799_v26 = vmax.f32 %v140_v21, 0.0  ;;  %s2685_s25 = smov 126   ;;  %s2686_s26 = smov 110   ;;  %v994_v61 = vld [vmem:[%s4044_s6] sm:$0xf] }
  0x67   :  { %v2787_v14 = vshrl.u32 %v4049_v12, 7  ;;  %s2687_s1 = smov 109   ;;  %s2688_s27 = smov 108   ;;  %v2692_v10 = vmov 1966171168   ;;  %vm189_vm0 = vcmask 1039360  }
  0x68   :  { %v152_v13 = vunpack.c.0.s8 %v151_v11  ;;  %s2689_s28 = smov 92   ;;  %s2690_s29 = smov 91   ;;  %v577_v11 = vunpack.c.l.s4 %v2692_v10  ;;  %vm187_vm1 = vcmask 1043456   ;;  %vm227_vm2 = vcmask 1031168  }
  0x69   :  { %2487 = vset.pattern.permute.xlu0 %v2676_v3  ;;  %2489 = vset.pattern.permute.xlu1 %v2677_v4  ;;  %s2691_s30 = smov 90   ;;  %s2879_s6 = sld [smem:[#allocation11]]  ;;  %vm265_vm3 = vcmask 900096   ;;  %vm303_vm4 = vcmask 891904   ;;  %vm341_vm5 = vcmask 883712   ;;  %vm379_vm6 = vcmask 752640  }
  0x6a   :  { %201 = vperm.xlu0 %2487, %v145_v0   ;;  %277 = vperm.xlu1 %2489, %v145_v0   ;;  %v2790_v17 = vsub.s32 %v152_v13, %v2787_v14  ;;  %s2881_s13 = sld [smem:[#allocation11 + $0x80]]  ;;  %v578_v16 = vunpack.c.0.s8 %v577_v11  ;;  %vm417_vm7 = vcmask 744448   ;;  %vm455_vm8 = vcmask 736256  }
  0x6b   :  { %s2885_s14 = sld [smem:[#allocation11 + $0x100]]  ;;  %vm3279_vm9 = vcmp.lt.s32.totalorder %v4049_v12, 686 }
  0x6c   :  { %s2889_s0 = sld [smem:[#allocation11 + $0x180]] }
  0x6d   :  { %s2891_s15 = sld [smem:[#allocation11 + $0x1]] }
  0x6e   :  { %2490 = vset.pattern.permute.xlu1 %v2678_v5  ;;  %2491 = vset.pattern.permute.xlu0 %v2679_v6  ;;  %s2893_s16 = sld [smem:[#allocation11 + $0x81]] }
  0x6f   :  { %315 = vperm.xlu1 %2490, %v145_v0   ;;  %353 = vperm.xlu0 %2491, %v145_v0   ;;  %s2897_s17 = sld [smem:[#allocation11 + $0x101]] }
  0x70   :  { %s2901_s2 = sld [smem:[#allocation11 + $0x181]] }
  0x71   :  { %s2903_s18 = sld [smem:[#allocation11 + $0x2]] }
  0x72   :  { %s2906_s19 = sld [smem:[#allocation11 + $0x82]] }
  0x73   :  { %2492 = vset.pattern.permute.xlu1 %v2680_v7  ;;  %2494 = vset.pattern.permute.xlu0 %v2681_v8  ;;  %s2910_s3 = sld [smem:[#allocation12]] }
  0x74   :  { %391 = vperm.xlu1 %2492, %v145_v0   ;;  %148 = vperm.xlu0 %2494, %v145_v0   ;;  %s2915_s20 = sld [smem:[#allocation11 + $0x102]] }
  0x75   :  { %s2920_s21 = sld [smem:[#allocation13]] }
  0x76   :  { %s2984_s7 = sld [smem:[#allocation11 + $0x182]] }
  0x77   :  { %s3047_s22 = sld [smem:[#allocation12 + $0x1]] }
  0x78   :  { %2493 = vset.pattern.permute.xlu1 %v2682_v9  ;;  %2495 = vset.pattern.permute.xlu0 %v2674_v1  ;;  %s3087_s4 = sld [smem:[#allocation11 + $0x3]] }
  0x79   :  { %429 = vperm.xlu1 %2493, %v145_v0   ;;  %s3093_s23 = sld [smem:[#allocation13 + $0x1]] }
  0x7a   :  { %s3100_s24 = sld [smem:[#allocation11 + $0x83]] }
  0x7b   :  { %s3106_s8 = sld [smem:[#allocation11 + $0x103]] }
  0x7c   :  { %s3110_s5 = sld [smem:[#allocation11 + $0x183]] }
  0x7d   :  { %2496 = vset.pattern.permute.xlu1 %v2676_v3  ;;  %s3114_s11 = sld [smem:[#allocation12 + $0x2]] }
  0x7e   :  { %s3120_s12 = sld [smem:[#allocation13 + $0x2]] }
  0x7f   :  { %s3449_s10 = sld [smem:[#allocation15 + $0x105]] }
  0x85   :  { %4065 = sst [smem:[#allocation30_spill]] %s3449_s10 }
  0x86   :  { %s3486_s10 = sld [smem:[#allocation15 + $0x6]] }
  0xe0   :  { %v163_v20 = vpop.permute.xlu0 %162  ;;  %v240_v25 = vpop.permute.xlu1 %239 }
  0xe1   :  { %v170_v22 = vrot.slane %v163_v20, %v2790_v17  ;;  %v247_v29 = vrot.slane %v240_v25, %v2790_v17 }
  0xe3   :  { %v174_v23 = vmul.f32 %v170_v22, %v2792_v18  ;;  %v172_v24 = vmul.f32 %v170_v22, %v2794_v19  ;;  %v173_v30 = vmul.f32 %v170_v22, %v2799_v26  ;;  %v249_v34 = vmul.f32 %v247_v29, %v2794_v19 }
  0xe4   :  { %v251_v36 = vmul.f32 %v247_v29, %v2792_v18  ;;  %v250_v39 = vmul.f32 %v247_v29, %v2799_v26 }
  0xe5   :  { %v202_v27 = vpop.permute.xlu0 %201  ;;  %182 = vrot.lane.b32.xlu0 %v174_v23, %s2684_s9  ;;  %178 = vrot.lane.b32.xlu1 %v172_v24, %s2684_s9  ;;  %v278_v33 = vpop.permute.xlu1 %277  ;;  %v2918_v24 = vsub.s32 %v578_v16, %v2787_v14 }
  0xe6   :  { %v209_v28 = vrot.slane %v202_v27, %v2790_v17  ;;  %v285_v35 = vrot.slane %v278_v33, %v2790_v17 }
  0xe8   :  { %v212_v31 = vmul.f32 %v209_v28, %v2799_v26  ;;  %v211_v32 = vmul.f32 %v209_v28, %v2794_v19  ;;  %v213_v37 = vmul.f32 %v209_v28, %v2792_v18  ;;  %v288_v41 = vmul.f32 %v285_v35, %v2799_v26 }
  0xe9   :  { %180 = vrot.lane.b32.xlu1 %v173_v30, %s2684_s9  ;;  %v287_v42 = vmul.f32 %v285_v35, %v2794_v19  ;;  %v289_v47 = vmul.f32 %v285_v35, %v2792_v18  ;;  %v2938_v35 = vstv %s2881_s13  ;;  %s3130_s13 = sld [smem:[#allocation13 + $0x3]] }
  0xea   :  { %219 = vrot.lane.b32.xlu0 %v212_v31, %s2685_s25  ;;  %v316_v38 = vpop.permute.xlu1 %315  ;;  %v354_v44 = vpop.permute.xlu0 %353 }
  0xeb   :  { %v323_v40 = vrot.slane %v316_v38, %v2790_v17  ;;  %v361_v45 = vrot.slane %v354_v44, %v2790_v17  ;;  %v2950_v38 = vstv %s2893_s16  ;;  %v2962_v44 = vstv %s2903_s18  ;;  %s3394_s16 = sld [smem:[#allocation18]] }
  0xec   :  { %s3400_s18 = sld [smem:[#allocation17 + $0x1]] }
  0xed   :  { %217 = vrot.lane.b32.xlu1 %v211_v32, %s2685_s25  ;;  %v325_v43 = vmul.f32 %v323_v40, %v2794_v19  ;;  %v327_v46 = vmul.f32 %v323_v40, %v2792_v18  ;;  %v326_v49 = vmul.f32 %v323_v40, %v2799_v26  ;;  %v364_v51 = vmul.f32 %v361_v45, %v2799_v26 }
  0xee   :  { %255 = vrot.lane.b32.xlu0 %v249_v34, %s2686_s26  ;;  %v363_v52 = vmul.f32 %v361_v45, %v2794_v19  ;;  %v365_v57 = vmul.f32 %v361_v45, %v2792_v18  ;;  %v2931_v32 = vstv %s2879_s6  ;;  %v2956_v40 = vstv %s2901_s2  ;;  %s3125_s6 = sld [smem:[#allocation12 + $0x3]] }
  0xef   :  { %v392_v48 = vpop.permute.xlu1 %391  ;;  %v149_v63 = vpop.permute.xlu0 %148  ;;  %s3398_s2 = sld [smem:[#allocation15 + $0x182]] }
  0xf0   :  { %v399_v50 = vrot.slane %v392_v48, %v2790_v17  ;;  %v156_v20 = vrot.slane %v149_v63, %v2790_v17 }
  0xf1   :  { %221 = vrot.lane.b32.xlu1 %v213_v37, %s2685_s25  ;;  %v2947_v37 = vstv %s2891_s15  ;;  %s3390_s15 = sld [smem:[#allocation17]] }
  0xf2   :  { %259 = vrot.lane.b32.xlu0 %v251_v36, %s2686_s26  ;;  %v401_v53 = vmul.f32 %v399_v50, %v2794_v19  ;;  %v403_v55 = vmul.f32 %v399_v50, %v2792_v18  ;;  %v402_v58 = vmul.f32 %v399_v50, %v2799_v26  ;;  %v2923_v25 = vmul.f32 %v156_v20, %v2794_v19 }
  0xf3   :  { %v160_v27 = vmul.f32 %v156_v20, %v2792_v18  ;;  %v159_v29 = vmul.f32 %v156_v20, %v2799_v26  ;;  %v2941_v36 = vstv %s2885_s14  ;;  %s3386_s14 = sld [smem:[#allocation15 + $0x181]] }
  0xf4   :  { %v430_v54 = vpop.permute.xlu1 %429 }
  0xf5   :  { %257 = vrot.lane.b32.xlu1 %v250_v39, %s2686_s26  ;;  %v437_v56 = vrot.slane %v430_v54, %v2790_v17  ;;  %v2953_v39 = vstv %s2897_s17  ;;  %s3396_s17 = sld [smem:[#allocation15 + $0x102]] }
  0xf6   :  { %295 = vrot.lane.b32.xlu0 %v288_v41, %s2687_s1 }
  0xf7   :  { %v440_v59 = vmul.f32 %v437_v56, %v2799_v26  ;;  %v439_v60 = vmul.f32 %v437_v56, %v2794_v19  ;;  %v441_v62 = vmul.f32 %v437_v56, %v2792_v18  ;;  %v2693_v19 = vmov 286326784  }
  0xf8   :  { %v547_v33 = vunpack.c.l.s4 %v2693_v19  ;;  %v2944_v26 = vstv %s2889_s0  ;;  %v2979_v56 = vstv %s2920_s21  ;;  %s3388_s0 = sld [smem:[#allocation15 + $0x2]] }
  0xf9   :  { %293 = vrot.lane.b32.xlu1 %v287_v42, %s2687_s1  ;;  %s3412_s21 = sld [smem:[#allocation15 + $0x103]] }
  0xfa   :  { %331 = vrot.lane.b32.xlu0 %v325_v43, %s2688_s27  ;;  %v548_v48 = vunpack.c.0.s8 %v547_v33 }
  0xfc   :  { %v2997_v10 = vsub.s32 %v548_v48, %v2787_v14 }
  0xfd   :  { %297 = vrot.lane.b32.xlu1 %v289_v47, %s2687_s1 }
  0xfe   :  { %335 = vrot.lane.b32.xlu0 %v327_v46, %s2688_s27 }
 0x101   :  { %333 = vrot.lane.b32.xlu1 %v326_v49, %s2688_s27 }
 0x102   :  { %371 = vrot.lane.b32.xlu0 %v364_v51, %s2689_s28 }
 0x105   :  { %369 = vrot.lane.b32.xlu1 %v363_v52, %s2689_s28  ;;  %v2971_v52 = vstv %s2906_s19  ;;  %s3402_s19 = sld [smem:[#allocation15 + $0x3]] }
 0x106   :  { %407 = vrot.lane.b32.xlu0 %v401_v53, %s2690_s29 }
 0x109   :  { %373 = vrot.lane.b32.xlu1 %v365_v57, %s2689_s28  ;;  %v2982_v57 = vstv %s2915_s20  ;;  %s3410_s20 = sld [smem:[#allocation15 + $0x83]] }
 0x10a   :  { %411 = vrot.lane.b32.xlu0 %v403_v55, %s2690_s29  ;;  %v2976_v55 = vstv %s2910_s3  ;;  %s3408_s3 = sld [smem:[#allocation18 + $0x1]] }
 0x10d   :  { %409 = vrot.lane.b32.xlu1 %v402_v58, %s2690_s29 }
 0x10e   :  { %447 = vrot.lane.b32.xlu0 %v440_v59, %s2691_s30 }
 0x111   :  { %445 = vrot.lane.b32.xlu1 %v439_v60, %s2691_s30  ;;  %v2694_v60 = vmov 1431651396  }
 0x112   :  { %1011 = vperm.xlu0 %2495, %v994_v61  }
 0x115   :  { %449 = vrot.lane.b32.xlu1 %v441_v62, %s2691_s30 }
 0x116   :  { %2498 = vset.pattern.permute.xlu0 %v2677_v4 }
 0x117   :  { %1122 = vperm.xlu0 %2498, %v994_v61  }
 0x119   :  { %1048 = vperm.xlu1 %2496, %v994_v61  }
 0x11b   :  { %2501 = vset.pattern.permute.xlu0 %v2680_v7 }
 0x11c   :  { %1233 = vperm.xlu0 %2501, %v994_v61  }
 0x11d   :  { %2497 = vset.pattern.permute.xlu1 %v2675_v2 }
 0x11e   :  { %1085 = vperm.xlu1 %2497, %v994_v61  }
 0x120   :  { %2504 = vset.pattern.permute.xlu0 %v2682_v9 }
 0x122   :  { %2499 = vset.pattern.permute.xlu1 %v2678_v5 }
 0x123   :  { %1159 = vperm.xlu1 %2499, %v994_v61  }
 0x127   :  { %2500 = vset.pattern.permute.xlu1 %v2679_v6 }
 0x128   :  { %1196 = vperm.xlu1 %2500, %v994_v61  }
 0x12c   :  { %2502 = vset.pattern.permute.xlu1 %v2682_v9 }
 0x12d   :  { %1270 = vperm.xlu1 %2502, %v994_v61  }
 0x131   :  { %2503 = vset.pattern.permute.xlu1 %v2681_v8 }
 0x132   :  { %997 = vperm.xlu1 %2503, %v994_v61   ;;  %v2990_v61 = vunpack.c.l.s4 %v2694_v60  ;;  %v3023_v60 = vstv %s2984_s7  ;;  %s3414_s7 = sld [smem:[#allocation15 + $0x183]] }
 0x157   :  { %v2865_v0 = vpop.permute.xlu0 %182  ;;  %v2867_v1 = vpop.permute.xlu1 %178 }
 0x158   :  { %v186_v22 = vrot.slane %v2865_v0, 4  ;;  %v184_v62 = vrot.slane %v2867_v1, 4 }
 0x15a   :  { %v193_v18 = vsel %vm189_vm0, %v2865_v0, %v186_v22 }
 0x15b   :  { %v2869_v2 = vpop.permute.xlu1 %180  ;;  %v199_v45 = vadd.f32 %v193_v18, %v160_v27  ;;  %v2695_v27 = vmov 858989090  }
 0x15c   :  { %v2871_v3 = vpop.permute.xlu0 %219  ;;  %v185_v30 = vrot.slane %v2869_v2, 4 }
 0x15d   :  { %v224_v41 = vrot.slane %v2871_v3, 4 }
 0x15e   :  { %v191_v46 = vsel %vm187_vm1, %v185_v30, %v186_v22  ;;  %v188_v19 = vsel %vm187_vm1, %v184_v62, %v185_v30 }
 0x15f   :  { %v2873_v4 = vpop.permute.xlu1 %217  ;;  %v192_v58 = vsel %vm189_vm0, %v2869_v2, %v191_v46 }
 0x160   :  { %v2875_v5 = vpop.permute.xlu0 %255  ;;  %v198_v20 = vadd.f32 %v192_v58, %v159_v29  ;;  %v223_v22 = vrot.slane %v2873_v4, 4 }
 0x161   :  { %v261_v33 = vrot.slane %v2875_v5, 4 }
 0x163   :  { %v222_v6 = vpop.permute.xlu1 %221 }
 0x164   :  { %v2877_v7 = vpop.permute.xlu0 %259  ;;  %v225_v28 = vrot.slane %v222_v6, 4 }
 0x165   :  { %v263_v43 = vrot.slane %v2877_v7, 4 }
 0x166   :  { %v231_v42 = vsel %vm227_vm2, %v222_v6, %v225_v28  ;;  %v229_v49 = vsel %vm187_vm1, %v224_v41, %v225_v28  ;;  %v3005_v28 = vunpack.c.l.s4 %v2695_v27 }
 0x167   :  { %v2883_v8 = vpop.permute.xlu1 %257  ;;  %v237_v53 = vadd.f32 %v231_v42, %v199_v45  ;;  %v269_v59 = vsel %vm265_vm3, %v2877_v7, %v263_v43  ;;  %v230_v63 = vsel %vm227_vm2, %v2871_v3, %v229_v49 }
 0x168   :  { %v2887_v9 = vpop.permute.xlu0 %295  ;;  %v262_v50 = vrot.slane %v2883_v8, 4 }
 0x169   :  { %v300_v0 = vrot.slane %v2887_v9, 4  ;;  %v275_v3 = vadd.f32 %v269_v59, %v237_v53  ;;  %v226_v59 = vsel %vm187_vm1, %v223_v22, %v224_v41 }
 0x16a   :  { %v267_v2 = vsel %vm187_vm1, %v262_v50, %v263_v43 }
 0x16b   :  { %v2895_v13 = vpop.permute.xlu1 %293  ;;  %v268_v43 = vsel %vm265_vm3, %v2883_v8, %v267_v2 }
 0x16c   :  { %v2899_v15 = vpop.permute.xlu0 %331  ;;  %v299_v29 = vrot.slane %v2895_v13, 4 }
 0x16e   :  { %v302_v22 = vsel %vm187_vm1, %v299_v29, %v300_v0 }
 0x16f   :  { %v2908_v21 = vpop.permute.xlu1 %297 }
 0x170   :  { %v2913_v23 = vpop.permute.xlu0 %335  ;;  %v301_v51 = vrot.slane %v2908_v21, 4 }
 0x171   :  { %v339_v11 = vrot.slane %v2913_v23, 4 }
 0x172   :  { %v307_v7 = vsel %vm303_vm4, %v2908_v21, %v301_v51  ;;  %v305_v18 = vsel %vm187_vm1, %v300_v0, %v301_v51  ;;  %v236_v21 = vadd.f32 %v230_v63, %v198_v20  ;;  %v190_v51 = vsel %vm189_vm0, %v2867_v1, %v188_v19 }
 0x173   :  { %v2928_v31 = vpop.permute.xlu1 %333  ;;  %v313_v45 = vadd.f32 %v307_v7, %v275_v3  ;;  %v345_v49 = vsel %vm341_vm5, %v2913_v23, %v339_v11  ;;  %v306_v8 = vsel %vm303_vm4, %v2887_v9, %v305_v18  ;;  %v264_v7 = vsel %vm187_vm1, %v261_v33, %v262_v50 }
 0x174   :  { %v2935_v34 = vpop.permute.xlu0 %371  ;;  %v338_v16 = vrot.slane %v2928_v31, 4  ;;  %v274_v62 = vadd.f32 %v268_v43, %v236_v21  ;;  %v228_v9 = vsel %vm227_vm2, %v2873_v4, %v226_v59  ;;  %v3044_v21 = vld [vmem:[#allocation8] sm:$0x3f]  ;;  %v562_v0 = vunpack.c.0.s8 %v2990_v61 }
 0x175   :  { %v376_v53 = vrot.slane %v2935_v34, 4  ;;  %v351_v20 = vadd.f32 %v345_v49, %v313_v45  ;;  %v304_v43 = vsel %vm303_vm4, %v2895_v13, %v302_v22 }
 0x176   :  { %v343_v30 = vsel %vm187_vm1, %v338_v16, %v339_v11  ;;  %v337_v11 = vrot.slane %v2899_v15, 4  ;;  %v312_v3 = vadd.f32 %v306_v8, %v274_v62  ;;  %v3057_v8 = vrot.slane %v3044_v21, %v2997_v10 }
 0x177   :  { %v2965_v47 = vpop.permute.xlu1 %369  ;;  %v344_v1 = vsel %vm341_vm5, %v2928_v31, %v343_v30  ;;  %v266_v31 = vsel %vm265_vm3, %v2875_v5, %v264_v7  ;;  %v565_v22 = vsub.s32 %v562_v0, %v2787_v14 }
 0x178   :  { %v2973_v54 = vpop.permute.xlu0 %407  ;;  %v375_v50 = vrot.slane %v2965_v47, 4  ;;  %v340_v29 = vsel %vm187_vm1, %v337_v11, %v338_v16 }
 0x179   :  { %v413_v5 = vrot.slane %v2973_v54, 4  ;;  %v342_v13 = vsel %vm341_vm5, %v2899_v15, %v340_v29 }
 0x17a   :  { %v378_v59 = vsel %vm187_vm1, %v375_v50, %v376_v53 }
 0x17b   :  { %v374_v6 = vpop.permute.xlu1 %373  ;;  %v380_v10 = vsel %vm379_vm6, %v2965_v47, %v378_v59 }
 0x17c   :  { %v377_v42 = vrot.slane %v374_v6, 4  ;;  %v412_v46 = vpop.permute.xlu0 %411 }
 0x17d   :  { %v415_v2 = vrot.slane %v412_v46, 4 }
 0x17e   :  { %v381_v63 = vsel %vm187_vm1, %v376_v53, %v377_v42  ;;  %v383_v23 = vsel %vm379_vm6, %v374_v6, %v377_v42  ;;  %v197_v6 = vadd.f32 %v190_v51, %v2923_v25  ;;  %v350_v42 = vadd.f32 %v344_v1, %v312_v3 }
 0x17f   :  { %v410_v48 = vpop.permute.xlu1 %409  ;;  %v389_v19 = vadd.f32 %v383_v23, %v351_v20  ;;  %v382_v33 = vsel %vm379_vm6, %v2935_v34, %v381_v63  ;;  %v421_v4 = vsel %vm417_vm7, %v412_v46, %v415_v2  ;;  %v555_v53 = vunpack.c.0.s8 %v3005_v28 }
 0x180   :  { %v414_v58 = vrot.slane %v410_v48, 4  ;;  %v448_v18 = vpop.permute.xlu0 %447  ;;  %v235_v25 = vadd.f32 %v228_v9, %v197_v6  ;;  %v388_v49 = vadd.f32 %v382_v33, %v350_v42  ;;  %v3085_v3 = vstv %s3047_s22  ;;  %s3420_s22 = sld [smem:[#allocation17 + $0x2]] }
 0x181   :  { %v452_v30 = vrot.slane %v448_v18, 4  ;;  %v427_v61 = vadd.f32 %v421_v4, %v389_v19 }
 0x182   :  { %v419_v27 = vsel %vm187_vm1, %v414_v58, %v415_v2  ;;  %v273_v51 = vadd.f32 %v266_v31, %v235_v25  ;;  %v416_v7 = vsel %vm187_vm1, %v413_v5, %v414_v58 }
 0x183   :  { %v3031_v41 = vpop.permute.xlu1 %445  ;;  %v420_v34 = vsel %vm417_vm7, %v410_v48, %v419_v27  ;;  %v418_v6 = vsel %vm417_vm7, %v2973_v54, %v416_v7 }
 0x184   :  { %v426_v16 = vadd.f32 %v420_v34, %v388_v49  ;;  %v311_v63 = vadd.f32 %v304_v43, %v273_v51  ;;  %v451_v15 = vrot.slane %v3031_v41, 4 }
 0x186   :  { %v349_v20 = vadd.f32 %v342_v13, %v311_v63  ;;  %v454_v33 = vsel %vm187_vm1, %v451_v15, %v452_v30  ;;  %v3128_v15 = vstv %s3087_s4  ;;  %s3422_s4 = sld [smem:[#allocation15 + $0x4]] }
 0x187   :  { %v450_v45 = vpop.permute.xlu1 %449 }
 0x188   :  { %v453_v46 = vrot.slane %v450_v45, 4  ;;  %v387_v27 = vadd.f32 %v380_v10, %v349_v20 }
 0x18a   :  { %v457_v48 = vsel %vm187_vm1, %v452_v30, %v453_v46  ;;  %v459_v62 = vsel %vm455_vm8, %v450_v45, %v453_v46 }
 0x18b   :  { %v458_v23 = vsel %vm455_vm8, %v448_v18, %v457_v48  ;;  %v3064_v2 = vadd.f32 %v459_v62, %v427_v61  ;;  %v558_v62 = vsub.s32 %v555_v53, %v2787_v14 }
 0x18c   :  { %v3071_v11 = vadd.f32 %v458_v23, %v426_v16  ;;  %v456_v16 = vsel %vm455_vm8, %v3031_v41, %v454_v33  ;;  %v425_v23 = vadd.f32 %v418_v6, %v387_v27  ;;  %v3134_v41 = vrot.slane %v3044_v21, %v565_v22 }
 0x18d   :  { %v476_v1 = vmul.f32 %v2938_v35, %v3064_v2  ;;  %v496_v9 = vmul.f32 %v2941_v36, %v3064_v2  ;;  %v516_v58 = vmul.f32 %v2944_v26, %v3064_v2  ;;  %v471_v50 = vmul.f32 %v2931_v32, %v3064_v2 }
 0x18e   :  { %v475_v28 = vmul.f32 %v2938_v35, %v3071_v11  ;;  %v495_v47 = vmul.f32 %v2941_v36, %v3071_v11  ;;  %v470_v18 = vmul.f32 %v2931_v32, %v3071_v11  ;;  %v515_v42 = vmul.f32 %v2944_v26, %v3071_v11 }
 0x18f   :  { %v2283_v19 = vrot.slane %v476_v1, 9  ;;  %v2287_v0 = vrot.slane %v496_v9, 10  ;;  %v627_v54 = vmul.f32 %v2950_v38, %v3071_v11  ;;  %v628_v25 = vmul.f32 %v2950_v38, %v3064_v2 }
 0x190   :  { %v2282_v31 = vrot.slane %v475_v28, 9  ;;  %v2286_v29 = vrot.slane %v495_v47, 10  ;;  %v2291_v34 = vrot.slane %v516_v58, 11  ;;  %v622_v45 = vmul.f32 %v2947_v37, %v3071_v11 }
 0x191   :  { %v491_v4 = vadd.f32 %v2283_v19, %v471_v50  ;;  %v2295_v49 = vrot.slane %v627_v54, 9  ;;  %v2296_v30 = vrot.slane %v628_v25, 9  ;;  %v647_v46 = vmul.f32 %v2953_v39, %v3071_v11 }
 0x192   :  { %v490_v43 = vadd.f32 %v2282_v31, %v470_v18  ;;  %v2290_v59 = vrot.slane %v515_v42, 11  ;;  %v623_v61 = vmul.f32 %v2947_v37, %v3064_v2  ;;  %v648_v13 = vmul.f32 %v2953_v39, %v3064_v2 }
 0x193   :  { %v511_v5 = vadd.f32 %v2287_v0, %v491_v4  ;;  %v642_v63 = vadd.f32 %v2295_v49, %v622_v45  ;;  %v2299_v1 = vrot.slane %v647_v46, 10  ;;  %v667_v14 = vmul.f32 %v2956_v40, %v3071_v11 }
 0x194   :  { %v510_v51 = vadd.f32 %v2286_v29, %v490_v43  ;;  %v643_v7 = vadd.f32 %v2296_v30, %v623_v61  ;;  %v3138_v53 = vadd.f32 %v456_v16, %v425_v23  ;;  %v2300_v9 = vrot.slane %v648_v13, 10 }
 0x195   :  { %v531_v48 = vadd.f32 %v2291_v34, %v511_v5  ;;  %v668_v28 = vmul.f32 %v2956_v40, %v3064_v2  ;;  %v751_v47 = vmul.f32 %v2971_v52, %v3071_v11  ;;  %v3145_v58 = vrot.slane %v3044_v21, %v558_v62 }
 0x196   :  { %v530_v10 = vadd.f32 %v2290_v59, %v510_v51  ;;  %v662_v22 = vadd.f32 %v2299_v1, %v642_v63  ;;  %v3148_v27 = vstv %s3093_s23  ;;  %v3151_v6 = vstv %s3100_s24  ;;  %s3424_s23 = sld [smem:[#allocation18 + $0x2]] }
 0x197   :  { %v536_v20 = vmul.f32 %v2976_v55, %v531_v48  ;;  %v663_v19 = vadd.f32 %v2300_v9, %v643_v7  ;;  %v752_v33 = vmul.f32 %v2971_v52, %v3064_v2  ;;  %v3157_v18 = vstv %s3106_s8  ;;  %s3426_s24 = sld [smem:[#allocation15 + $0x84]] }
 0x198   :  { %v535_v50 = vmul.f32 %v2976_v55, %v530_v10  ;;  %v2303_v42 = vrot.slane %v667_v14, 11  ;;  %v2310_v21 = vrot.slane %v751_v47, 9  ;;  %v3161_v4 = vstv %s3110_s5  ;;  %s3432_s8 = sld [smem:[#allocation15 + $0x104]] }
 0x199   :  { %v541_v31 = vadd.f32 %v2979_v56, %v536_v20  ;;  %v2304_v0 = vrot.slane %v668_v28, 11  ;;  %v3164_v54 = vstv %s3114_s11  ;;  %v3167_v25 = vstv %s3120_s12  ;;  %s3434_s5 = sld [smem:[#allocation15 + $0x184]] }
 0x19a   :  { %v474_v43 = vmul.f32 %v2938_v35, %v3138_v53  ;;  %v682_v29 = vadd.f32 %v2303_v42, %v662_v22  ;;  %v746_v34 = vmul.f32 %v2962_v44, %v3071_v11  ;;  %v771_v45 = vmul.f32 %v2982_v57, %v3071_v11  ;;  %s3436_s11 = sld [smem:[#allocation17 + $0x3]] }
 0x19b   :  { %v3176_v5 = vstv %s3125_s6  ;;  %v540_v49 = vadd.f32 %v2979_v56, %v535_v50  ;;  %v683_v30 = vadd.f32 %v2304_v0, %v663_v19  ;;  %v2311_v46 = vrot.slane %v752_v33, 9  ;;  %s3439_s12 = sld [smem:[#allocation15 + $0x5]] }
 0x19c   :  { %v3180_v51 = vstv %s3130_s13  ;;  %v544_v59 = vmax.f32 %v541_v31, 0.0  ;;  %v766_v61 = vadd.f32 %v2310_v21, %v746_v34  ;;  %v469_v35 = vmul.f32 %v2931_v32, %v3138_v53  ;;  %s3445_s6 = sld [smem:[#allocation18 + $0x3]] }
 0x19d   :  { %v494_v13 = vmul.f32 %v2941_v36, %v3138_v53  ;;  %v747_v16 = vmul.f32 %v2962_v44, %v3064_v2  ;;  %v772_v48 = vmul.f32 %v2982_v57, %v3064_v2  ;;  %v2281_v62 = vrot.slane %v474_v43, 9  ;;  %s3447_s13 = sld [smem:[#allocation15 + $0x85]] }
 0x19e   :  { %v514_v63 = vmul.f32 %v2944_v26, %v3138_v53  ;;  %v687_v23 = vmul.f32 %v3085_v3, %v682_v29  ;;  %v2314_v10 = vrot.slane %v771_v45, 10  ;;  %v791_v7 = vmul.f32 %v3023_v60, %v3071_v11 }
 0x19f   :  { %v621_v32 = vmul.f32 %v2947_v37, %v3138_v53  ;;  %v543_v36 = vmax.f32 %v540_v49, 0.0  ;;  %v688_v20 = vmul.f32 %v3085_v3, %v683_v30  ;;  %v767_v1 = vadd.f32 %v2311_v46, %v747_v16 }
 0x1a0   :  { %v875_v14 = vmul.f32 %v3151_v6, %v3071_v11  ;;  %v3201_v9 = vmul.f32 %v3134_v41, %v544_v59  ;;  %v786_v26 = vadd.f32 %v2314_v10, %v766_v61  ;;  %v792_v28 = vmul.f32 %v3023_v60, %v3064_v2 }
 0x1a1   :  { %v876_v47 = vmul.f32 %v3151_v6, %v3064_v2  ;;  %v2315_v22 = vrot.slane %v772_v48, 10  ;;  %v870_v37 = vmul.f32 %v3128_v15, %v3071_v11  ;;  %v895_v19 = vmul.f32 %v3157_v18, %v3071_v11  ;;  %4064 = sst [smem:[#allocation29_spill]] %s3439_s12 }
 0x1a2   :  { %v2325_v50 = vrot.slane %v875_v14, 9  ;;  %v2318_v33 = vrot.slane %v791_v7, 11  ;;  %v871_v31 = vmul.f32 %v3128_v15, %v3064_v2  ;;  %v896_v21 = vmul.f32 %v3157_v18, %v3064_v2  ;;  %s3454_s12 = sld [smem:[#allocation15 + $0x185]] }
 0x1a3   :  { %v2326_v42 = vrot.slane %v876_v47, 9  ;;  %v692_v0 = vadd.f32 %v3148_v27, %v687_v23  ;;  %v787_v43 = vadd.f32 %v2315_v22, %v767_v1  ;;  %v626_v34 = vmul.f32 %v2950_v38, %v3138_v53 }
 0x1a4   :  { %v890_v29 = vadd.f32 %v2325_v50, %v870_v37  ;;  %v2319_v45 = vrot.slane %v792_v28, 11  ;;  %v806_v49 = vadd.f32 %v2318_v33, %v786_v26  ;;  %v489_v46 = vadd.f32 %v2281_v62, %v469_v35 }
 0x1a5   :  { %v891_v30 = vadd.f32 %v2326_v42, %v871_v31  ;;  %v2329_v59 = vrot.slane %v895_v19, 10  ;;  %v2330_v61 = vrot.slane %v896_v21, 10  ;;  %v915_v16 = vmul.f32 %v3161_v4, %v3071_v11 }
 0x1a6   :  { %v916_v48 = vmul.f32 %v3161_v4, %v3064_v2  ;;  %v3223_v10 = vmul.f32 %v3145_v58, %v543_v36  ;;  %v596_v23 = vrot.slane %v3201_v9, %v2918_v24  ;;  %v693_v38 = vadd.f32 %v3148_v27, %v688_v20 }
 0x1a7   :  { %v2285_v7 = vrot.slane %v494_v13, 10  ;;  %v695_v1 = vmax.f32 %v692_v0, 0.0  ;;  %v807_v14 = vadd.f32 %v2319_v45, %v787_v43  ;;  %v910_v35 = vadd.f32 %v2329_v59, %v890_v29 }
 0x1a8   :  { %v911_v62 = vadd.f32 %v2330_v61, %v891_v30  ;;  %v2289_v28 = vrot.slane %v514_v63, 11  ;;  %v2294_v47 = vrot.slane %v626_v34, 9  ;;  %v646_v11 = vmul.f32 %v2953_v39, %v3138_v53  ;;  %4066 = sst [smem:[#allocation31_spill]] %s3454_s12 }
 0x1a9   :  { %v509_v26 = vadd.f32 %v2285_v7, %v489_v46  ;;  %v811_v2 = vmul.f32 %v3164_v54, %v806_v49  ;;  %v2333_v36 = vrot.slane %v915_v16, 11  ;;  %v2334_v22 = vrot.slane %v916_v48, 11  ;;  %s3472_s12 = sld [smem:[#allocation17 + $0x4]] }
 0x1aa   :  { %v666_v37 = vmul.f32 %v2956_v40, %v3138_v53  ;;  %v696_v50 = vmax.f32 %v693_v38, 0.0  ;;  %v641_v13 = vadd.f32 %v2294_v47, %v621_v32  ;;  %v2298_v19 = vrot.slane %v646_v11, 10 }
 0x1ab   :  { %v529_v20 = vadd.f32 %v2289_v28, %v509_v26  ;;  %v589_v33 = vrot.slane %v3223_v10, %v2918_v24  ;;  %v812_v63 = vmul.f32 %v3164_v54, %v807_v14  ;;  %v930_v31 = vadd.f32 %v2333_v36, %v910_v35 }
 0x1ac   :  { %v931_v42 = vadd.f32 %v2334_v22, %v911_v62  ;;  %v661_v21 = vadd.f32 %v2298_v19, %v641_v13  ;;  %v2302_v0 = vrot.slane %v666_v37, 11  ;;  %v750_v43 = vmul.f32 %v2971_v52, %v3138_v53 }
 0x1ad   :  { %v534_v39 = vmul.f32 %v2976_v55, %v529_v20  ;;  %v698_v40 = vmul.f32 %v695_v1, %v3145_v58  ;;  %v816_v29 = vadd.f32 %v3167_v25, %v811_v2  ;;  %v745_v32 = vmul.f32 %v2962_v44, %v3138_v53 }
 0x1ae   :  { %v770_v34 = vmul.f32 %v2982_v57, %v3138_v53  ;;  %v681_v49 = vadd.f32 %v2302_v0, %v661_v21  ;;  %v2309_v30 = vrot.slane %v750_v43, 9  ;;  %v790_v55 = vmul.f32 %v3023_v60, %v3138_v53 }
 0x1af   :  { %v539_v45 = vadd.f32 %v2979_v56, %v534_v39  ;;  %v817_v46 = vadd.f32 %v3167_v25, %v812_v63  ;;  %v935_v52 = vmul.f32 %v3176_v5, %v930_v31  ;;  %v936_v59 = vmul.f32 %v3176_v5, %v931_v42 }
 0x1b0   :  { %v874_v61 = vmul.f32 %v3151_v6, %v3138_v53  ;;  %v686_v16 = vmul.f32 %v3085_v3, %v681_v49  ;;  %v765_v57 = vadd.f32 %v2309_v30, %v745_v32  ;;  %v2313_v48 = vrot.slane %v770_v34, 10 }
 0x1b1   :  { %v542_v44 = vmax.f32 %v539_v45, 0.0  ;;  %v869_v56 = vmul.f32 %v3128_v15, %v3138_v53  ;;  %v894_v60 = vmul.f32 %v3157_v18, %v3138_v53  ;;  %v914_v38 = vmul.f32 %v3161_v4, %v3138_v53 }
 0x1b2   :  { %v2324_v10 = vrot.slane %v874_v61, 9  ;;  %v691_v1 = vadd.f32 %v3148_v27, %v686_v16  ;;  %v785_v6 = vadd.f32 %v2313_v48, %v765_v57  ;;  %v2317_v14 = vrot.slane %v790_v55, 11 }
 0x1b3   :  { %v570_v7 = vmul.f32 %v3057_v8, %v542_v44  ;;  %v699_v3 = vmul.f32 %v696_v50, %v3134_v41  ;;  %v940_v35 = vadd.f32 %v3180_v51, %v935_v52  ;;  %v2328_v26 = vrot.slane %v894_v60, 10 }
 0x1b4   :  { %v889_v62 = vadd.f32 %v2324_v10, %v869_v56  ;;  %v819_v15 = vmax.f32 %v816_v29, 0.0  ;;  %v694_v47 = vmax.f32 %v691_v1, 0.0  ;;  %v805_v18 = vadd.f32 %v2317_v14, %v785_v6  ;;  %v1012_v10 = vpop.permute.xlu0 %1011 }
 0x1b5   :  { %v582_v28 = vrot.slane %v570_v7, %v2918_v24  ;;  %v716_v11 = vrot.slane %v698_v40, %v2918_v24  ;;  %v941_v53 = vadd.f32 %v3180_v51, %v936_v59  ;;  %v2332_v2 = vrot.slane %v914_v38, 11  ;;  %v1049_v38 = vpop.permute.xlu1 %1048 }
 0x1b6   :  { %v909_v4 = vadd.f32 %v2328_v26, %v889_v62  ;;  %v820_v27 = vmax.f32 %v817_v46, 0.0  ;;  %v697_v22 = vmul.f32 %v694_v47, %v3057_v8  ;;  %v810_v37 = vmul.f32 %v3164_v54, %v805_v18 }
 0x1b7   :  { %v597_v36 = vcombine.low %v582_v28, %v589_v33  ;;  %v611_v50 = vrot.slane %v596_v23, %v2918_v24  ;;  %v723_v20 = vrot.slane %v699_v3, %v2918_v24  ;;  %v943_v13 = vmax.f32 %v940_v35, 0.0 }
 0x1b8   :  { %v929_v19 = vadd.f32 %v2332_v2, %v909_v4  ;;  %v822_v63 = vmul.f32 %v819_v15, %v3145_v58  ;;  %v709_v42 = vrot.slane %v697_v22, %v2918_v24  ;;  %v815_v33 = vadd.f32 %v3167_v25, %v810_v37 }
 0x1b9   :  { %v604_v31 = vrot.slane %v597_v36, %v2918_v24  ;;  %v944_v39 = vmax.f32 %v941_v53, 0.0  ;;  %v823_v23 = vmul.f32 %v820_v27, %v3134_v41  ;;  %v946_v40 = vmul.f32 %v943_v13, %v3145_v58  ;;  %v1086_v15 = vpop.permute.xlu1 %1085 }
 0x1ba   :  { %v934_v9 = vmul.f32 %v3176_v5, %v929_v19  ;;  %v724_v0 = vcombine.low %v709_v42, %v716_v11  ;;  %v818_v43 = vmax.f32 %v815_v33, 0.0  ;;  %v738_v32 = vrot.slane %v723_v20, %v2918_v24  ;;  %v1123_v11 = vpop.permute.xlu0 %1122 }
 0x1bb   :  { %v612_v21 = vcombine.low %v604_v31, %v611_v50  ;;  %v840_v25 = vrot.slane %v822_v63, %v2918_v24  ;;  %v947_v45 = vmul.f32 %v944_v39, %v3134_v41  ;;  %v847_v30 = vrot.slane %v823_v23, %v2918_v24 }
 0x1bc   :  { %v939_v29 = vadd.f32 %v3180_v51, %v934_v9  ;;  %v731_v34 = vrot.slane %v724_v0, %v2918_v24  ;;  %v821_v5 = vmul.f32 %v818_v43, %v3057_v8  ;;  %v964_v51 = vrot.slane %v946_v40, %v2918_v24 }
 0x1bd   :  { %618 = vst.msk [vmem:[#allocation2] ss:$4 sm:$0x3f] %vm3279_vm9, %v612_v21  ;;  %v971_v59 = vrot.slane %v947_v45, %v2918_v24  ;;  %v862_v41 = vrot.slane %v847_v30, %v2918_v24  ;;  %v1019_v60 = vrot.slane %v1012_v10, %v2790_v17  ;;  %v1056_v6 = vrot.slane %v1049_v38, %v2790_v17  ;;  %v1160_v22 = vpop.permute.xlu1 %1159 }
 0x1be   :  { %v942_v49 = vmax.f32 %v939_v29, 0.0  ;;  %v739_v55 = vcombine.low %v731_v34, %v738_v32  ;;  %v833_v58 = vrot.slane %v821_v5, %v2918_v24  ;;  %v1093_v28 = vrot.slane %v1086_v15, %v2790_v17  ;;  %v1234_v54 = vpop.permute.xlu0 %1233 }
 0x1bf   :  { %v986_v48 = vrot.slane %v971_v59, %v2918_v24  ;;  %v1130_v53 = vrot.slane %v1123_v11, %v2790_v17  ;;  %v1167_v37 = vrot.slane %v1160_v22, %v2790_v17  ;;  %v1241_v39 = vrot.slane %v1234_v54, %v2790_v17 }
 0x1c0   :  { %v945_v46 = vmul.f32 %v942_v49, %v3057_v8  ;;  %742 = vst.msk [vmem:[#allocation2 + $0x1] ss:$4 sm:$0x3f] %vm3279_vm9, %v739_v55  ;;  %v848_v52 = vcombine.low %v833_v58, %v840_v25  ;;  %v3489_v38 = vstv %s3390_s15  ;;  %v3524_v11 = vstv %s3400_s18  ;;  %s3661_s15 = sld [smem:[#allocation15 + $0x87]] }
 0x1c1   :  { %v1197_v13 = vpop.permute.xlu1 %1196  ;;  %v3546_v22 = vstv %s3424_s23  ;;  %s3995_s18 = sld [smem:[#allocation17 + $0x7]] }
 0x1c2   :  { %v957_v61 = vrot.slane %v945_v46, %v2918_v24  ;;  %v855_v44 = vrot.slane %v848_v52, %v2918_v24  ;;  %v1204_v19 = vrot.slane %v1197_v13, %v2790_v17  ;;  %v3558_v13 = vstv %s3426_s24 }
 0x1c4   :  { %v972_v16 = vcombine.low %v957_v61, %v964_v51  ;;  %v863_v57 = vcombine.low %v855_v44, %v862_v41 }
 0x1c5   :  { %v1271_v21 = vpop.permute.xlu1 %1270 }
 0x1c6   :  { %v979_v56 = vrot.slane %v972_v16, %v2918_v24  ;;  %866 = vst.msk [vmem:[#allocation2 + $0x2] ss:$4 sm:$0x3f] %vm3279_vm9, %v863_v57  ;;  %v1278_v0 = vrot.slane %v1271_v21, %v2790_v17 }
 0x1c8   :  { %v987_v8 = vcombine.low %v979_v56, %v986_v48 }
 0x1c9   :  { %v998_v5 = vpop.permute.xlu1 %997 }
 0x1ca   :  { %990 = vst.msk [vmem:[#allocation2 + $0x3] ss:$4 sm:$0x3f] %vm3279_vm9, %v987_v8  ;;  %v1005_v46 = vrot.slane %v998_v5, %v2790_v17 }
 0x1d1   :  { %v3311_v7 = vld [vmem:[#allocation2 + $0x8] sm:$0xff]  ;;  %v3313_v1 = vld [vmem:[#allocation2] sm:$0xff]  ;;  %v3318_v35 = vld [vmem:[#allocation2 + $0x10] sm:$0xff] }
 0x1d2   :  { %v1022_v14 = vmul.f32 %v1019_v60, %v3311_v7  ;;  %v1021_v3 = vmul.f32 %v1019_v60, %v3313_v1  ;;  %v1058_v62 = vmul.f32 %v1056_v6, %v3313_v1  ;;  %v1023_v26 = vmul.f32 %v1019_v60, %v3318_v35 }
 0x1d3   :  { %v1060_v47 = vmul.f32 %v1056_v6, %v3318_v35  ;;  %v1059_v18 = vmul.f32 %v1056_v6, %v3311_v7  ;;  %v1096_v4 = vmul.f32 %v1093_v28, %v3311_v7  ;;  %v1095_v2 = vmul.f32 %v1093_v28, %v3313_v1 }
 0x1d4   :  { %1029 = vrot.lane.b32.xlu1 %v1022_v14, %s2684_s9  ;;  %1027 = vrot.lane.b32.xlu0 %v1021_v3, %s2684_s9  ;;  %v1132_v27 = vmul.f32 %v1130_v53, %v3313_v1  ;;  %v1097_v36 = vmul.f32 %v1093_v28, %v3318_v35  ;;  %v1134_v50 = vmul.f32 %v1130_v53, %v3318_v35  ;;  %v3498_v6 = vstv %s3388_s0  ;;  %s3656_s0 = sld [smem:[#allocation18 + $0x5]] }
 0x1d5   :  { %v1133_v20 = vmul.f32 %v1130_v53, %v3311_v7  ;;  %v1170_v63 = vmul.f32 %v1167_v37, %v3311_v7  ;;  %v1169_v31 = vmul.f32 %v1167_v37, %v3313_v1  ;;  %v1206_v42 = vmul.f32 %v1204_v19, %v3313_v1 }
 0x1d6   :  { %v1171_v33 = vmul.f32 %v1167_v37, %v3318_v35  ;;  %v1208_v9 = vmul.f32 %v1204_v19, %v3318_v35  ;;  %v1207_v23 = vmul.f32 %v1204_v19, %v3311_v7  ;;  %v1244_v43 = vmul.f32 %v1241_v39, %v3311_v7 }
 0x1d7   :  { %v1243_v40 = vmul.f32 %v1241_v39, %v3313_v1  ;;  %v1280_v29 = vmul.f32 %v1278_v0, %v3313_v1  ;;  %v1245_v32 = vmul.f32 %v1241_v39, %v3318_v35  ;;  %v1282_v25 = vmul.f32 %v1278_v0, %v3318_v35 }
 0x1d8   :  { %1064 = vrot.lane.b32.xlu1 %v1058_v62, %s2685_s25  ;;  %1031 = vrot.lane.b32.xlu0 %v1023_v26, %s2684_s9  ;;  %v1281_v34 = vmul.f32 %v1278_v0, %v3311_v7  ;;  %s3372_s9 = sld [smem:[#allocation15]]  ;;  %v3452_v17 = vmul.f32 %v1005_v46, %v3311_v7  ;;  %v3457_v61 = vmul.f32 %v1005_v46, %v3313_v1  ;;  %v3495_v1 = vstv %s3386_s14 }
 0x1d9   :  { %v3460_v41 = vmul.f32 %v1005_v46, %v3318_v35  ;;  %v3503_v14 = vstv %s3394_s16  ;;  %v3509_v35 = vstv %s3396_s17  ;;  %v3512_v62 = vstv %s3398_s2  ;;  %s3586_s14 = sld [smem:[#allocation17 + $0x5]] }
 0x1da   :  { %v3529_v53 = vstv %s3408_s3  ;;  %v3549_v37 = vstv %s3414_s7  ;;  %v3561_v19 = vstv %s3432_s8  ;;  %v3581_v0 = vstv %s3447_s13  ;;  %s3672_s16 = sld [smem:[#allocation15 + $0x187]]  ;;  %s2696_s3 = smov [#allocation20]  }
 0x1db   :  { %4072 = vst [vmem:[#allocation34_spill] sm:$0xff] %v3581_v0  ;;  %s3677_s17 = sld [smem:[#allocation17 + $0x6]] }
 0x1dc   :  { %1068 = vrot.lane.b32.xlu1 %v1060_v47, %s2685_s25  ;;  %1066 = vrot.lane.b32.xlu0 %v1059_v18, %s2685_s25  ;;  %s3374_s25 = sld [smem:[#allocation15 + $0x80]] }
 0x1dd   :  { %s3682_s2 = sld [smem:[#allocation18 + $0x6]] }
 0x1de   :  { %v3467_v57 = vstv %s3372_s9  ;;  %s3500_s9 = sld [smem:[#allocation18 + $0x4]] }
 0x1e0   :  { %1103 = vrot.lane.b32.xlu1 %v1096_v4, %s2686_s26  ;;  %1101 = vrot.lane.b32.xlu0 %v1095_v2, %s2686_s26  ;;  %v3532_v4 = vstv %s3402_s19  ;;  %v3535_v2 = vstv %s3410_s20  ;;  %s2453_s19 = sld [smem:[#allocation18 + $0x7]]  ;;  %s2265_s20 = sshll.u32 %s2696_s3, 4  ;;  %s2266_s20 = int_to_ptr.vmem [resolvable:$true] %s2265_s20 }
 0x1e1   :  { %p2634_p8 = scmp.lt.s32.totalorder %s2266_s20, %s2266_s20 }
 0x1e2   :  { %v3470_v48 = vstv %s3374_s25  ;;  %s3514_s25 = sld [smem:[#allocation15 + $0x86]] }
 0x1e4   :  { %1138 = vrot.lane.b32.xlu1 %v1132_v27, %s2687_s1  ;;  %1105 = vrot.lane.b32.xlu0 %v1097_v36, %s2686_s26  ;;  %s3376_s26 = sld [smem:[#allocation15 + $0x100]]  ;;  %v3538_v27 = vstv %s3412_s21  ;;  %v3543_v36 = vstv %s3420_s22  ;;  %s2629_s21 = scalar_lea.vmem %s2266_s20, 768 }
 0x1e5   :  { %p2630_p7 = scmp.ne.s32.totalorder %s2266_s20, %s2629_s21  ;;  %p2635_p9 = scmp.lt.s32.totalorder %s2629_s21, %s2629_s21 }
 0x1e7   :  { %p2636_p10 = por %p2635_p9, %p2634_p8 }
 0x1e8   :  { %1142 = vrot.lane.b32.xlu1 %v1134_v50, %s2687_s1  ;;  %1140 = vrot.lane.b32.xlu0 %v1133_v20, %s2687_s1  ;;  %s3378_s1 = sld [smem:[#allocation15 + $0x180]]  ;;  %v3552_v50 = vstv %s3422_s4  ;;  %v3555_v20 = vstv %s3436_s11 }
 0x1e9   :  { %p2637_p11 = pnand %p2636_p10, %p2630_p7 }
 0x1ea   :  { %v3475_v56 = vstv %s3376_s26  ;;  %s3526_s26 = sld [smem:[#allocation15 + $0x106]] }
 0x1ec   :  { %1177 = vrot.lane.b32.xlu1 %v1170_v63, %s2688_s27  ;;  %1175 = vrot.lane.b32.xlu0 %v1169_v31, %s2688_s27  ;;  %v3564_v63 = vstv %s3434_s5 }
 0x1ed   :  { %4070 = vst [vmem:[#allocation32_spill] sm:$0xff] %v3564_v63 }
 0x1ee   :  { %v3478_v8 = vstv %s3378_s1  ;;  %s3540_s1 = sld [smem:[#allocation15 + $0x186]] }
 0x1f0   :  { %1212 = vrot.lane.b32.xlu1 %v1206_v42, %s2689_s28  ;;  %1179 = vrot.lane.b32.xlu0 %v1171_v33, %s2688_s27  ;;  %s3380_s27 = sld [smem:[#allocation15 + $0x1]] }
 0x1f4   :  { %1216 = vrot.lane.b32.xlu1 %v1208_v9, %s2689_s28  ;;  %1214 = vrot.lane.b32.xlu0 %v1207_v23, %s2689_s28  ;;  %s3382_s28 = sld [smem:[#allocation15 + $0x81]]  ;;  %v3575_v23 = vstv %s3445_s6 }
 0x1f6   :  { %v3481_v10 = vstv %s3380_s27  ;;  %s4067_s27 = sld [smem:[#allocation29_spill]] }
 0x1f8   :  { %1251 = vrot.lane.b32.xlu1 %v1244_v43, %s2690_s29  ;;  %1249 = vrot.lane.b32.xlu0 %v1243_v40, %s2690_s29 }
 0x1fa   :  { %v3484_v60 = vstv %s3382_s28  ;;  %s4068_s28 = sld [smem:[#allocation30_spill]] }
 0x1fc   :  { %1286 = vrot.lane.b32.xlu1 %v1280_v29, %s2691_s30  ;;  %1253 = vrot.lane.b32.xlu0 %v1245_v32, %s2690_s29  ;;  %s3384_s29 = sld [smem:[#allocation15 + $0x101]]  ;;  %v3578_v21 = vstv %s4067_s27  ;;  %v3590_v29 = vstv %s3472_s12 }
 0x1fd   :  { %4071 = vst [vmem:[#allocation33_spill] sm:$0xff] %v3578_v21  ;;  %4074 = vst [vmem:[#allocation36_spill] sm:$0xff] %v3590_v29 }
 0x200   :  { %1290 = vrot.lane.b32.xlu1 %v1282_v25, %s2691_s30  ;;  %1288 = vrot.lane.b32.xlu0 %v1281_v34, %s2691_s30  ;;  %s3392_s30 = sld [smem:[#allocation15 + $0x82]]  ;;  %v3584_v43 = vstv %s4068_s28  ;;  %v3596_v25 = vstv %s3486_s10 }
 0x201   :  { %4073 = vst [vmem:[#allocation35_spill] sm:$0xff] %v3584_v43  ;;  %4076 = vst [vmem:[#allocation38_spill] sm:$0xff] %v3596_v25  ;;  %s3643_s10 = sld [smem:[#allocation15 + $0x7]] }
 0x202   :  { %v3492_v7 = vstv %s3384_s29  ;;  %s4069_s29 = sld [smem:[#allocation31_spill]] }
 0x206   :  { %v3506_v3 = vstv %s3392_s30  ;;  %s3666_s30 = sld [smem:[#allocation15 + $0x107]] }
 0x208   :  { %v3593_v32 = vstv %s4069_s29 }
 0x209   :  { %4075 = vst [vmem:[#allocation37_spill] sm:$0xff] %v3593_v32 }
 0x246   :  { %v3404_v45 = vpop.permute.xlu1 %1029  ;;  %v3406_v49 = vpop.permute.xlu0 %1027 }
 0x247   :  { %v1034_v26 = vrot.slane %v3404_v45, 4  ;;  %v1033_v15 = vrot.slane %v3406_v49, 4 }
 0x249   :  { %v1036_v31 = vsel %vm187_vm1, %v1033_v15, %v1034_v26 }
 0x24a   :  { %v3416_v30 = vpop.permute.xlu1 %1064  ;;  %v3418_v55 = vpop.permute.xlu0 %1031  ;;  %v1037_v34 = vsel %vm189_vm0, %v3406_v49, %v1036_v31  ;;  %v3615_v31 = vstv %s3514_s25 }
 0x24b   :  { %v1035_v28 = vrot.slane %v3418_v55, 4  ;;  %v1070_v40 = vrot.slane %v3416_v30, 4  ;;  %4078 = vst [vmem:[#allocation40_spill] sm:$0xff] %v3615_v31 }
 0x24d   :  { %v1038_v42 = vsel %vm187_vm1, %v1034_v26, %v1035_v28  ;;  %v1040_v5 = vsel %vm189_vm0, %v3418_v55, %v1035_v28  ;;  %v3605_v26 = vstv %s3500_s9  ;;  %v3618_v55 = vstv %s3526_s26 }
 0x24e   :  { %v3428_v58 = vpop.permute.xlu1 %1068  ;;  %v3430_v51 = vpop.permute.xlu0 %1066  ;;  %v1039_v46 = vsel %vm189_vm0, %v3404_v45, %v1038_v42  ;;  %4077 = vst [vmem:[#allocation39_spill] sm:$0xff] %v3605_v26  ;;  %4079 = vst [vmem:[#allocation41_spill] sm:$0xff] %v3618_v55  ;;  %v3621_v45 = vstv %s3540_s1  ;;  %v1044_v28 = vadd.f32 %v1037_v34, %v3457_v61  ;;  %v1046_v42 = vadd.f32 %v1040_v5, %v3460_v41 }
 0x24f   :  { %v1072_v33 = vrot.slane %v3428_v58, 4  ;;  %v1071_v54 = vrot.slane %v3430_v51, 4  ;;  %4080 = vst [vmem:[#allocation42_spill] sm:$0xff] %v3621_v45  ;;  %v1045_v26 = vadd.f32 %v1039_v46, %v3452_v17 }
 0x251   :  { %v1073_v15 = vsel %vm187_vm1, %v1070_v40, %v1071_v54  ;;  %v1075_v12 = vsel %vm187_vm1, %v1071_v54, %v1072_v33  ;;  %v1077_v54 = vsel %vm227_vm2, %v3428_v58, %v1072_v33 }
 0x252   :  { %v3441_v52 = vpop.permute.xlu1 %1103  ;;  %v3443_v59 = vpop.permute.xlu0 %1101  ;;  %v1076_v0 = vsel %vm227_vm2, %v3430_v51, %v1075_v12  ;;  %v1074_v55 = vsel %vm227_vm2, %v3416_v30, %v1073_v15  ;;  %v1083_v31 = vadd.f32 %v1077_v54, %v1046_v42  ;;  %v3640_v12 = vstv %s3586_s14 }
 0x253   :  { %v1108_v29 = vrot.slane %v3441_v52, 4  ;;  %v1107_v32 = vrot.slane %v3443_v59, 4  ;;  %v1082_v51 = vadd.f32 %v1076_v0, %v1045_v26  ;;  %v1081_v30 = vadd.f32 %v1074_v55, %v1044_v28 }
 0x255   :  { %v1110_v61 = vsel %vm187_vm1, %v1107_v32, %v1108_v29 }
 0x256   :  { %v3462_v44 = vpop.permute.xlu1 %1138  ;;  %v3464_v16 = vpop.permute.xlu0 %1105  ;;  %v1111_v32 = vsel %vm265_vm3, %v3443_v59, %v1110_v61 }
 0x257   :  { %v1109_v49 = vrot.slane %v3464_v16, 4  ;;  %v1144_v41 = vrot.slane %v3462_v44, 4 }
 0x259   :  { %v1112_v17 = vsel %vm187_vm1, %v1108_v29, %v1109_v49  ;;  %v1114_v63 = vsel %vm265_vm3, %v3464_v16, %v1109_v49 }
 0x25a   :  { %v3519_v47 = vpop.permute.xlu1 %1142  ;;  %v3521_v18 = vpop.permute.xlu0 %1140  ;;  %v1113_v0 = vsel %vm265_vm3, %v3441_v52, %v1112_v17 }
 0x25b   :  { %v1145_v40 = vrot.slane %v3521_v18, 4  ;;  %v1146_v45 = vrot.slane %v3519_v47, 4 }
 0x25d   :  { %v1147_v15 = vsel %vm187_vm1, %v1144_v41, %v1145_v40  ;;  %v1149_v42 = vsel %vm187_vm1, %v1145_v40, %v1146_v45  ;;  %v1151_v29 = vsel %vm303_vm4, %v3519_v47, %v1146_v45  ;;  %v1118_v47 = vadd.f32 %v1111_v32, %v1081_v30 }
 0x25e   :  { %v3570_v39 = vpop.permute.xlu1 %1177  ;;  %v3572_v9 = vpop.permute.xlu0 %1175  ;;  %v1148_v59 = vsel %vm303_vm4, %v3462_v44, %v1147_v15  ;;  %v1120_v45 = vadd.f32 %v1114_v63, %v1083_v31  ;;  %v1150_v52 = vsel %vm303_vm4, %v3521_v18, %v1149_v42 }
 0x25f   :  { %v1182_v34 = vrot.slane %v3570_v39, 4  ;;  %v1181_v58 = vrot.slane %v3572_v9, 4  ;;  %v1155_v63 = vadd.f32 %v1148_v59, %v1118_v47  ;;  %v3693_v47 = vstv %s3656_s0 }
 0x260   :  { %v1157_v30 = vadd.f32 %v1151_v29, %v1120_v45  ;;  %v3686_v29 = vstv %s3643_s10 }
 0x261   :  { %v1184_v26 = vsel %vm187_vm1, %v1181_v58, %v1182_v34  ;;  %v1119_v58 = vadd.f32 %v1113_v0, %v1082_v51 }
 0x262   :  { %v3611_v25 = vpop.permute.xlu1 %1212  ;;  %v1180_v43 = vpop.permute.xlu0 %1179  ;;  %v1185_v17 = vsel %vm341_vm5, %v3572_v9, %v1184_v26 }
 0x263   :  { %v1183_v46 = vrot.slane %v1180_v43, 4  ;;  %v1218_v55 = vrot.slane %v3611_v25, 4  ;;  %v1156_v51 = vadd.f32 %v1150_v52, %v1119_v58 }
 0x265   :  { %v1186_v16 = vsel %vm187_vm1, %v1182_v34, %v1183_v46  ;;  %v1188_v44 = vsel %vm341_vm5, %v1180_v43, %v1183_v46  ;;  %v1192_v46 = vadd.f32 %v1185_v17, %v1155_v63  ;;  %v3699_v17 = vstv %s3666_s30 }
 0x266   :  { %v1217_v33 = vpop.permute.xlu1 %1216  ;;  %v1215_v5 = vpop.permute.xlu0 %1214  ;;  %v1187_v18 = vsel %vm341_vm5, %v3570_v39, %v1186_v16  ;;  %v1194_v42 = vadd.f32 %v1188_v44, %v1157_v30 }
 0x267   :  { %v1219_v21 = vrot.slane %v1215_v5, 4  ;;  %v1220_v54 = vrot.slane %v1217_v33, 4  ;;  %v1193_v0 = vadd.f32 %v1187_v18, %v1156_v51 }
 0x269   :  { %v1221_v61 = vsel %vm187_vm1, %v1218_v55, %v1219_v21  ;;  %v1223_v34 = vsel %vm187_vm1, %v1219_v21, %v1220_v54  ;;  %v1225_v9 = vsel %vm379_vm6, %v1217_v33, %v1220_v54 }
 0x26a   :  { %v1252_v28 = vpop.permute.xlu1 %1251  ;;  %v1250_v41 = vpop.permute.xlu0 %1249  ;;  %v1222_v21 = vsel %vm379_vm6, %v3611_v25, %v1221_v61  ;;  %v1224_v39 = vsel %vm379_vm6, %v1215_v5, %v1223_v34  ;;  %v1231_v25 = vadd.f32 %v1225_v9, %v1194_v42 }
 0x26b   :  { %v1256_v49 = vrot.slane %v1252_v28, 4  ;;  %v1255_v40 = vrot.slane %v1250_v41, 4  ;;  %v1229_v55 = vadd.f32 %v1222_v21, %v1192_v46  ;;  %v1230_v5 = vadd.f32 %v1224_v39, %v1193_v0 }
 0x26c   :  { %v3716_v21 = vstv %s3677_s17 }
 0x26d   :  { %v1258_v31 = vsel %vm187_vm1, %v1255_v40, %v1256_v49 }
 0x26e   :  { %v1287_v15 = vpop.permute.xlu1 %1286  ;;  %v1254_v32 = vpop.permute.xlu0 %1253  ;;  %v1259_v26 = vsel %vm417_vm7, %v1250_v41, %v1258_v31 }
 0x26f   :  { %v1257_v43 = vrot.slane %v1254_v32, 4  ;;  %v1292_v45 = vrot.slane %v1287_v15, 4  ;;  %v1266_v41 = vadd.f32 %v1259_v26, %v1229_v55 }
 0x271   :  { %v1260_v33 = vsel %vm187_vm1, %v1256_v49, %v1257_v43  ;;  %v1262_v54 = vsel %vm417_vm7, %v1254_v32, %v1257_v43  ;;  %v3696_v49 = vstv %s3661_s15  ;;  %v3709_v32 = vstv %s3672_s16 }
 0x272   :  { %v1261_v59 = vsel %vm417_vm7, %v1252_v28, %v1260_v33  ;;  %v1291_v16 = vpop.permute.xlu1 %1290  ;;  %v1289_v40 = vpop.permute.xlu0 %1288  ;;  %v1268_v58 = vadd.f32 %v1262_v54, %v1231_v25  ;;  %v3719_v43 = vstv %s3682_s2 }
 0x273   :  { %v1294_v52 = vrot.slane %v1291_v16, 4  ;;  %v1293_v61 = vrot.slane %v1289_v40, 4  ;;  %v1267_v44 = vadd.f32 %v1261_v59, %v1230_v5 }
 0x275   :  { %v1299_v28 = vsel %vm455_vm8, %v1291_v16, %v1294_v52  ;;  %v1295_v34 = vsel %vm187_vm1, %v1292_v45, %v1293_v61  ;;  %v1297_v30 = vsel %vm187_vm1, %v1293_v61, %v1294_v52 }
 0x276   :  { %v3704_v63 = vadd.f32 %v1299_v28, %v1268_v58  ;;  %v1296_v18 = vsel %vm455_vm8, %v1287_v15, %v1295_v34  ;;  %v1298_v31 = vsel %vm455_vm8, %v1289_v40, %v1297_v30 }
 0x277   :  { %v3711_v51 = vadd.f32 %v1296_v18, %v1266_v41  ;;  %v3713_v9 = vadd.f32 %v1298_v31, %v1267_v44 }
 0x278   :  { %v1310_v46 = vmul.f32 %v3467_v57, %v3704_v63  ;;  %v1315_v42 = vmul.f32 %v3470_v48, %v3704_v63  ;;  %v1335_v15 = vmul.f32 %v3475_v56, %v3704_v63  ;;  %v1355_v39 = vmul.f32 %v3478_v8, %v3704_v63 }
 0x279   :  { %v1308_v0 = vmul.f32 %v3467_v57, %v3711_v51  ;;  %v1309_v26 = vmul.f32 %v3467_v57, %v3713_v9  ;;  %v1313_v33 = vmul.f32 %v3470_v48, %v3711_v51  ;;  %v1314_v54 = vmul.f32 %v3470_v48, %v3713_v9 }
 0x27a   :  { %v2340_v25 = vrot.slane %v1315_v42, 9  ;;  %v1333_v55 = vmul.f32 %v3475_v56, %v3711_v51  ;;  %v1334_v59 = vmul.f32 %v3475_v56, %v3713_v9  ;;  %v2344_v16 = vrot.slane %v1335_v15, 10 }
 0x27b   :  { %v2338_v40 = vrot.slane %v1313_v33, 9  ;;  %v2339_v5 = vrot.slane %v1314_v54, 9  ;;  %v1353_v45 = vmul.f32 %v3478_v8, %v3711_v51  ;;  %v1354_v57 = vmul.f32 %v3478_v8, %v3713_v9 }
 0x27c   :  { %v1330_v52 = vadd.f32 %v2340_v25, %v1310_v46  ;;  %v2342_v61 = vrot.slane %v1333_v55, 10  ;;  %v2343_v41 = vrot.slane %v1334_v59, 10  ;;  %v2348_v48 = vrot.slane %v1355_v39, 11 }
 0x27d   :  { %v1328_v58 = vadd.f32 %v2338_v40, %v1308_v0  ;;  %v1329_v44 = vadd.f32 %v2339_v5, %v1309_v26  ;;  %v2346_v28 = vrot.slane %v1353_v45, 11  ;;  %v2347_v34 = vrot.slane %v1354_v57, 11 }
 0x27e   :  { %v1350_v30 = vadd.f32 %v2344_v16, %v1330_v52  ;;  %v1428_v56 = vmul.f32 %v3481_v10, %v3711_v51  ;;  %v1429_v18 = vmul.f32 %v3481_v10, %v3713_v9  ;;  %v1430_v31 = vmul.f32 %v3481_v10, %v3704_v63 }
 0x27f   :  { %v1348_v42 = vadd.f32 %v2342_v61, %v1328_v58  ;;  %v1349_v8 = vadd.f32 %v2343_v41, %v1329_v44  ;;  %v1433_v46 = vmul.f32 %v3484_v60, %v3711_v51  ;;  %v1434_v15 = vmul.f32 %v3484_v60, %v3713_v9 }
 0x280   :  { %v1370_v39 = vadd.f32 %v2348_v48, %v1350_v30  ;;  %v1435_v0 = vmul.f32 %v3484_v60, %v3704_v63  ;;  %v1453_v26 = vmul.f32 %v3492_v7, %v3711_v51  ;;  %v1454_v33 = vmul.f32 %v3492_v7, %v3713_v9 }
 0x281   :  { %v1368_v54 = vadd.f32 %v2346_v28, %v1348_v42  ;;  %v1369_v10 = vadd.f32 %v2347_v34, %v1349_v8  ;;  %v2351_v25 = vrot.slane %v1433_v46, 9  ;;  %v2352_v55 = vrot.slane %v1434_v15, 9 }
 0x282   :  { %v1375_v59 = vmul.f32 %v3489_v38, %v1370_v39  ;;  %v2353_v16 = vrot.slane %v1435_v0, 9  ;;  %v1455_v40 = vmul.f32 %v3492_v7, %v3704_v63  ;;  %v2355_v5 = vrot.slane %v1453_v26, 10 }
 0x283   :  { %v1373_v45 = vmul.f32 %v3489_v38, %v1368_v54  ;;  %v1374_v60 = vmul.f32 %v3489_v38, %v1369_v10  ;;  %v1448_v57 = vadd.f32 %v2351_v25, %v1428_v56  ;;  %v1449_v52 = vadd.f32 %v2352_v55, %v1429_v18 }
 0x284   :  { %v1380_v61 = vadd.f32 %v3503_v14, %v1375_v59  ;;  %v4081_v41 = vlaneseq  ;;  %v1450_v58 = vadd.f32 %v2353_v16, %v1430_v31  ;;  %v2356_v44 = vrot.slane %v1454_v33, 10 }
 0x285   :  { %v2357_v28 = vrot.slane %v1455_v40, 10  ;;  %v1378_v34 = vadd.f32 %v3503_v14, %v1373_v45  ;;  %v1379_v7 = vadd.f32 %v3503_v14, %v1374_v60  ;;  %v1468_v30 = vadd.f32 %v2355_v5, %v1448_v57 }
 0x286   :  { %vm3768_vm10 = vcmp.lt.s32.totalorder %v4081_v41, 648  ;;  %v1473_v38 = vmul.f32 %v3495_v1, %v3711_v51  ;;  %v1404_v56 = vrot.slane %v1380_v61, %v2918_v24  ;;  %v1469_v18 = vadd.f32 %v2356_v44, %v1449_v52 }
 0x287   :  { %v1470_v42 = vadd.f32 %v2357_v28, %v1450_v58  ;;  %v1474_v8 = vmul.f32 %v3495_v1, %v3713_v9  ;;  %v1390_v46 = vrot.slane %v1378_v34, %v2918_v24  ;;  %v1397_v31 = vrot.slane %v1379_v7, %v2918_v24 }
 0x288   :  { %v1475_v15 = vmul.f32 %v3495_v1, %v3704_v63  ;;  %v2359_v39 = vrot.slane %v1473_v38, 11  ;;  %v1419_v14 = vrot.slane %v1404_v56, %v2918_v24  ;;  %v1547_v26 = vmul.f32 %v3498_v6, %v3711_v51 }
 0x289   :  { %v2360_v0 = vrot.slane %v1474_v8, 11  ;;  %v1548_v33 = vmul.f32 %v3498_v6, %v3713_v9  ;;  %v1405_v54 = vcombine.low %v1390_v46, %v1397_v31  ;;  %v1549_v55 = vmul.f32 %v3498_v6, %v3704_v63 }
 0x28a   :  { %v2361_v10 = vrot.slane %v1475_v15, 11  ;;  %v1488_v25 = vadd.f32 %v2359_v39, %v1468_v30  ;;  %v1552_v1 = vmul.f32 %v3506_v3, %v3711_v51  ;;  %v1553_v16 = vmul.f32 %v3506_v3, %v3713_v9 }
 0x28b   :  { %v1489_v59 = vadd.f32 %v2360_v0, %v1469_v18  ;;  %v1554_v40 = vmul.f32 %v3506_v3, %v3704_v63  ;;  %v1412_v5 = vrot.slane %v1405_v54, %v2918_v24  ;;  %v1572_v57 = vmul.f32 %v3509_v35, %v3711_v51 }
 0x28c   :  { %v1490_v45 = vadd.f32 %v2361_v10, %v1470_v42  ;;  %v1493_v60 = vmul.f32 %v3524_v11, %v1488_v25  ;;  %v2366_v52 = vrot.slane %v1552_v1, 9  ;;  %v2367_v61 = vrot.slane %v1553_v16, 9 }
 0x28d   :  { %v1494_v6 = vmul.f32 %v3524_v11, %v1489_v59  ;;  %v2368_v41 = vrot.slane %v1554_v40, 9  ;;  %v1420_v58 = vcombine.low %v1412_v5, %v1419_v14  ;;  %v1573_v3 = vmul.f32 %v3509_v35, %v3713_v9 }
 0x28e   :  { %v1495_v44 = vmul.f32 %v3524_v11, %v1490_v45  ;;  %v1498_v28 = vadd.f32 %v3529_v53, %v1493_v60  ;;  %v1567_v7 = vadd.f32 %v2366_v52, %v1547_v26  ;;  %v1568_v30 = vadd.f32 %v2367_v61, %v1548_v33 }
 0x28f   :  { %v1499_v34 = vadd.f32 %v3529_v53, %v1494_v6  ;;  %v1569_v38 = vadd.f32 %v2368_v41, %v1549_v55  ;;  %1424 = vst.msk [vmem:[#allocation20] ss:$8 sm:$0xf] %vm3768_vm10, %v1420_v58  ;;  %1425 = vst.msk [vmem:[#allocation20] ss:$8 sm:$0x30] %vm3768_vm10, %v1420_v58  ;;  %v1574_v18 = vmul.f32 %v3509_v35, %v3704_v63 }
 0x290   :  { %v1500_v56 = vadd.f32 %v3529_v53, %v1495_v44  ;;  %v1510_v11 = vrot.slane %v1498_v28, %v2918_v24  ;;  %v2370_v42 = vrot.slane %v1572_v57, 10  ;;  %v2371_v46 = vrot.slane %v1573_v3, 10 }
 0x291   :  { %v1517_v8 = vrot.slane %v1499_v34, %v2918_v24  ;;  %v1592_v31 = vmul.f32 %v3512_v62, %v3711_v51  ;;  %v1593_v15 = vmul.f32 %v3512_v62, %v3713_v9  ;;  %v2372_v14 = vrot.slane %v1574_v18, 10 }
 0x292   :  { %v1524_v39 = vrot.slane %v1500_v56, %v2918_v24  ;;  %v1587_v0 = vadd.f32 %v2370_v42, %v1567_v7  ;;  %v1594_v53 = vmul.f32 %v3512_v62, %v3704_v63  ;;  %v1588_v33 = vadd.f32 %v2371_v46, %v1568_v30 }
 0x293   :  { %v1525_v26 = vcombine.low %v1510_v11, %v1517_v8  ;;  %v2374_v35 = vrot.slane %v1592_v31, 11  ;;  %v2375_v54 = vrot.slane %v1593_v15, 11  ;;  %v1589_v25 = vadd.f32 %v2372_v14, %v1569_v38 }
 0x294   :  { %v1539_v10 = vrot.slane %v1524_v39, %v2918_v24  ;;  %v2376_v55 = vrot.slane %v1594_v53, 11  ;;  %v1666_v59 = vmul.f32 %v3532_v4, %v3711_v51  ;;  %v1667_v5 = vmul.f32 %v3532_v4, %v3713_v9 }
 0x295   :  { %v1532_v1 = vrot.slane %v1525_v26, %v2918_v24  ;;  %v1607_v16 = vadd.f32 %v2374_v35, %v1587_v0  ;;  %v1608_v40 = vadd.f32 %v2375_v54, %v1588_v33  ;;  %v1668_v62 = vmul.f32 %v3532_v4, %v3704_v63 }
 0x296   :  { %v1609_v45 = vadd.f32 %v2376_v55, %v1589_v25  ;;  %v1671_v60 = vmul.f32 %v3535_v2, %v3711_v51  ;;  %v1672_v57 = vmul.f32 %v3535_v2, %v3713_v9  ;;  %v1673_v41 = vmul.f32 %v3535_v2, %v3704_v63 }
 0x297   :  { %v1540_v6 = vcombine.low %v1532_v1, %v1539_v10  ;;  %v1612_v52 = vmul.f32 %v3543_v36, %v1607_v16  ;;  %v1613_v61 = vmul.f32 %v3543_v36, %v1608_v40  ;;  %v1691_v4 = vmul.f32 %v3538_v27, %v3711_v51 }
 0x298   :  { %v1614_v58 = vmul.f32 %v3543_v36, %v1609_v45  ;;  %v2381_v44 = vrot.slane %v1671_v60, 9  ;;  %v2382_v28 = vrot.slane %v1672_v57, 9  ;;  %v2383_v7 = vrot.slane %v1673_v41, 9 }
 0x299   :  { %1543 = vst.msk [vmem:[#allocation20 + $0x1] ss:$8 sm:$0xf] %vm3768_vm10, %v1540_v6  ;;  %1544 = vst.msk [vmem:[#allocation20 + $0x1] ss:$8 sm:$0x30] %vm3768_vm10, %v1540_v6  ;;  %v1617_v3 = vadd.f32 %v3546_v22, %v1612_v52  ;;  %v1618_v34 = vadd.f32 %v3546_v22, %v1613_v61  ;;  %v1692_v2 = vmul.f32 %v3538_v27, %v3713_v9 }
 0x29a   :  { %v1619_v36 = vadd.f32 %v3546_v22, %v1614_v58  ;;  %v1686_v30 = vadd.f32 %v2381_v44, %v1666_v59  ;;  %v1687_v38 = vadd.f32 %v2382_v28, %v1667_v5  ;;  %v1693_v56 = vmul.f32 %v3538_v27, %v3704_v63 }
 0x29b   :  { %v1629_v11 = vrot.slane %v1617_v3, %v2918_v24  ;;  %v1636_v18 = vrot.slane %v1618_v34, %v2918_v24  ;;  %v1688_v42 = vadd.f32 %v2383_v7, %v1668_v62  ;;  %v2385_v8 = vrot.slane %v1691_v4, 10 }
 0x29c   :  { %v1643_v46 = vrot.slane %v1619_v36, %v2918_v24  ;;  %v2386_v31 = vrot.slane %v1692_v2, 10  ;;  %v2387_v15 = vrot.slane %v1693_v56, 10  ;;  %v1711_v39 = vmul.f32 %v3549_v37, %v3711_v51 }
 0x29d   :  { %v1644_v14 = vcombine.low %v1629_v11, %v1636_v18  ;;  %v1706_v22 = vadd.f32 %v2385_v8, %v1686_v30  ;;  %v1712_v0 = vmul.f32 %v3549_v37, %v3713_v9  ;;  %v1713_v27 = vmul.f32 %v3549_v37, %v3704_v63 }
 0x29e   :  { %v1658_v53 = vrot.slane %v1643_v46, %v2918_v24  ;;  %v1707_v26 = vadd.f32 %v2386_v31, %v1687_v38  ;;  %v1708_v33 = vadd.f32 %v2387_v15, %v1688_v42  ;;  %v2389_v35 = vrot.slane %v1711_v39, 11  ;;  %v4084_v42 = vld [vmem:[#allocation32_spill] sm:$0xff] }
 0x29f   :  { %v1651_v54 = vrot.slane %v1644_v14, %v2918_v24  ;;  %v2390_v10 = vrot.slane %v1712_v0, 11  ;;  %v2391_v25 = vrot.slane %v1713_v27, 11  ;;  %v1785_v55 = vmul.f32 %v3552_v50, %v3711_v51 }
 0x2a0   :  { %v1726_v59 = vadd.f32 %v2389_v35, %v1706_v22  ;;  %v1786_v1 = vmul.f32 %v3552_v50, %v3713_v9  ;;  %v1787_v16 = vmul.f32 %v3552_v50, %v3704_v63  ;;  %v1790_v37 = vmul.f32 %v3558_v13, %v3711_v51  ;;  %v4085_v22 = vld [vmem:[#allocation33_spill] sm:$0xff] }
 0x2a1   :  { %v1659_v40 = vcombine.low %v1651_v54, %v1658_v53  ;;  %v1727_v5 = vadd.f32 %v2390_v10, %v1707_v26  ;;  %v1728_v45 = vadd.f32 %v2391_v25, %v1708_v33  ;;  %v1791_v62 = vmul.f32 %v3558_v13, %v3713_v9  ;;  %v4086_v10 = vld [vmem:[#allocation34_spill] sm:$0xff] }
 0x2a2   :  { %v1731_v60 = vmul.f32 %v3555_v20, %v1726_v59  ;;  %v1792_v57 = vmul.f32 %v3558_v13, %v3704_v63  ;;  %v2396_v6 = vrot.slane %v1790_v37, 9  ;;  %v1810_v52 = vmul.f32 %v3561_v19, %v3711_v51  ;;  %v4087_v37 = vld [vmem:[#allocation35_spill] sm:$0xff] }
 0x2a3   :  { %1662 = vst.msk [vmem:[#allocation20 + $0x2] ss:$8 sm:$0xf] %vm3768_vm10, %v1659_v40  ;;  %1663 = vst.msk [vmem:[#allocation20 + $0x2] ss:$8 sm:$0x30] %vm3768_vm10, %v1659_v40  ;;  %v1732_v50 = vmul.f32 %v3555_v20, %v1727_v5  ;;  %v1733_v61 = vmul.f32 %v3555_v20, %v1728_v45  ;;  %v1811_v58 = vmul.f32 %v3561_v19, %v3713_v9 }
 0x2a4   :  { %v2397_v41 = vrot.slane %v1791_v62, 9  ;;  %v1736_v13 = vadd.f32 %v3575_v23, %v1731_v60  ;;  %v2398_v44 = vrot.slane %v1792_v57, 9  ;;  %v1805_v28 = vadd.f32 %v2396_v6, %v1785_v55  ;;  %v4088_v45 = vld [vmem:[#allocation36_spill] sm:$0xff] }
 0x2a5   :  { %v1812_v4 = vmul.f32 %v3561_v19, %v3704_v63  ;;  %v1737_v3 = vadd.f32 %v3575_v23, %v1732_v50  ;;  %v1738_v34 = vadd.f32 %v3575_v23, %v1733_v61  ;;  %v2400_v2 = vrot.slane %v1810_v52, 10 }
 0x2a6   :  { %v1806_v7 = vadd.f32 %v2397_v41, %v1786_v1  ;;  %v1748_v36 = vrot.slane %v1736_v13, %v2918_v24  ;;  %v1807_v20 = vadd.f32 %v2398_v44, %v1787_v16  ;;  %v2401_v30 = vrot.slane %v1811_v58, 10  ;;  %v4089_v41 = vld [vmem:[#allocation39_spill] sm:$0xff] }
 0x2a7   :  { %v2402_v38 = vrot.slane %v1812_v4, 10  ;;  %v1755_v56 = vrot.slane %v1737_v3, %v2918_v24  ;;  %v1762_v11 = vrot.slane %v1738_v34, %v2918_v24  ;;  %v1825_v18 = vadd.f32 %v2400_v2, %v1805_v28 }
 0x2a8   :  { %v1830_v8 = vmul.f32 %v4084_v42, %v3711_v51  ;;  %v1826_v19 = vadd.f32 %v2401_v30, %v1806_v7  ;;  %v1831_v23 = vmul.f32 %v4084_v42, %v3713_v9  ;;  %v1832_v31 = vmul.f32 %v4084_v42, %v3704_v63  ;;  %v4090_v30 = vld [vmem:[#allocation37_spill] sm:$0xff] }
 0x2a9   :  { %v1827_v46 = vadd.f32 %v2402_v38, %v1807_v20  ;;  %v1763_v15 = vcombine.low %v1748_v36, %v1755_v56  ;;  %v1777_v39 = vrot.slane %v1762_v11, %v2918_v24  ;;  %v1904_v0 = vmul.f32 %v4085_v22, %v3711_v51 }
 0x2aa   :  { %v2404_v14 = vrot.slane %v1830_v8, 11  ;;  %v2405_v27 = vrot.slane %v1831_v23, 11  ;;  %v2406_v53 = vrot.slane %v1832_v31, 11  ;;  %v1905_v26 = vmul.f32 %v4085_v22, %v3713_v9 }
 0x2ab   :  { %v1906_v33 = vmul.f32 %v4085_v22, %v3704_v63  ;;  %v1770_v35 = vrot.slane %v1763_v15, %v2918_v24  ;;  %v1909_v25 = vmul.f32 %v4086_v10, %v3711_v51  ;;  %v1910_v55 = vmul.f32 %v4086_v10, %v3713_v9 }
 0x2ac   :  { %v1845_v54 = vadd.f32 %v2404_v14, %v1825_v18  ;;  %v1846_v59 = vadd.f32 %v2405_v27, %v1826_v19  ;;  %v1847_v1 = vadd.f32 %v2406_v53, %v1827_v46  ;;  %v1911_v16 = vmul.f32 %v4086_v10, %v3704_v63  ;;  %v4091_v14 = vld [vmem:[#allocation38_spill] sm:$0xff] }
 0x2ad   :  { %v1929_v40 = vmul.f32 %v4087_v37, %v3711_v51  ;;  %v1778_v5 = vcombine.low %v1770_v35, %v1777_v39  ;;  %v2411_v60 = vrot.slane %v1909_v25, 9  ;;  %v2412_v57 = vrot.slane %v1910_v55, 9 }
 0x2ae   :  { %v1850_v62 = vmul.f32 %v4088_v45, %v1845_v54  ;;  %v1851_v6 = vmul.f32 %v4088_v45, %v1846_v59  ;;  %v1852_v52 = vmul.f32 %v4088_v45, %v1847_v1  ;;  %v2413_v50 = vrot.slane %v1911_v16, 9  ;;  %v4092_v54 = vld [vmem:[#allocation40_spill] sm:$0xff]  ;;  %v4093_v16 = vld [vmem:[#allocation41_spill] sm:$0xff] }
 0x2af   :  { %v1930_v61 = vmul.f32 %v4087_v37, %v3713_v9  ;;  %1781 = vst.msk [vmem:[#allocation20 + $0x3] ss:$8 sm:$0xf] %vm3768_vm10, %v1778_v5  ;;  %1782 = vst.msk [vmem:[#allocation20 + $0x3] ss:$8 sm:$0x30] %vm3768_vm10, %v1778_v5  ;;  %v1924_v13 = vadd.f32 %v2411_v60, %v1904_v0  ;;  %v1925_v44 = vadd.f32 %v2412_v57, %v1905_v26 }
 0x2b0   :  { %v1855_v58 = vadd.f32 %v4089_v41, %v1850_v62  ;;  %v1931_v28 = vmul.f32 %v4087_v37, %v3704_v63  ;;  %v1856_v4 = vadd.f32 %v4089_v41, %v1851_v6  ;;  %v1857_v3 = vadd.f32 %v4089_v41, %v1852_v52 }
 0x2b1   :  { %v1926_v34 = vadd.f32 %v2413_v50, %v1906_v33  ;;  %v2415_v7 = vrot.slane %v1929_v40, 10  ;;  %v2416_v36 = vrot.slane %v1930_v61, 10  ;;  %v1949_v38 = vmul.f32 %v4090_v30, %v3711_v51 }
 0x2b2   :  { %v1867_v2 = vrot.slane %v1855_v58, %v2918_v24  ;;  %v2417_v20 = vrot.slane %v1931_v28, 10  ;;  %v1874_v56 = vrot.slane %v1856_v4, %v2918_v24  ;;  %v1881_v11 = vrot.slane %v1857_v3, %v2918_v24 }
 0x2b3   :  { %v1944_v18 = vadd.f32 %v2415_v7, %v1924_v13  ;;  %v1950_v42 = vmul.f32 %v4090_v30, %v3713_v9  ;;  %v1945_v8 = vadd.f32 %v2416_v36, %v1925_v44  ;;  %v1951_v46 = vmul.f32 %v4090_v30, %v3704_v63  ;;  %v4094_v7 = vld [vmem:[#allocation42_spill] sm:$0xff] }
 0x2b4   :  { %v1946_v19 = vadd.f32 %v2417_v20, %v1926_v34  ;;  %v2419_v23 = vrot.slane %v1949_v38, 11  ;;  %v1882_v31 = vcombine.low %v1867_v2, %v1874_v56  ;;  %v1896_v15 = vrot.slane %v1881_v11, %v2918_v24 }
 0x2b5   :  { %v2420_v39 = vrot.slane %v1950_v42, 11  ;;  %v2023_v22 = vmul.f32 %v4091_v14, %v3711_v51  ;;  %v2421_v0 = vrot.slane %v1951_v46, 11  ;;  %v2024_v53 = vmul.f32 %v4091_v14, %v3713_v9 }
 0x2b6   :  { %v1964_v27 = vadd.f32 %v2419_v23, %v1944_v18  ;;  %v2025_v26 = vmul.f32 %v4091_v14, %v3704_v63  ;;  %v1889_v33 = vrot.slane %v1882_v31, %v2918_v24  ;;  %v2028_v10 = vmul.f32 %v4092_v54, %v3711_v51 }
 0x2b7   :  { %v1965_v35 = vadd.f32 %v2420_v39, %v1945_v8  ;;  %v2029_v25 = vmul.f32 %v4092_v54, %v3713_v9  ;;  %v1966_v55 = vadd.f32 %v2421_v0, %v1946_v19  ;;  %v2030_v1 = vmul.f32 %v4092_v54, %v3704_v63 }
 0x2b8   :  { %v1969_v59 = vmul.f32 %v3640_v12, %v1964_v27  ;;  %v2048_v37 = vmul.f32 %v4093_v16, %v3711_v51  ;;  %v1897_v40 = vcombine.low %v1889_v33, %v1896_v15  ;;  %v2426_v45 = vrot.slane %v2028_v10, 9 }
 0x2b9   :  { %v1970_v5 = vmul.f32 %v3640_v12, %v1965_v35  ;;  %v2427_v62 = vrot.slane %v2029_v25, 9  ;;  %v1971_v60 = vmul.f32 %v3640_v12, %v1966_v55  ;;  %v2428_v6 = vrot.slane %v2030_v1, 9 }
 0x2ba   :  { %v1974_v57 = vadd.f32 %v3693_v47, %v1969_v59  ;;  %v2049_v52 = vmul.f32 %v4093_v16, %v3713_v9  ;;  %1900 = vst.msk [vmem:[#allocation20 + $0x4] ss:$8 sm:$0xf] %vm3768_vm10, %v1897_v40  ;;  %1901 = vst.msk [vmem:[#allocation20 + $0x4] ss:$8 sm:$0x30] %vm3768_vm10, %v1897_v40  ;;  %v2043_v61 = vadd.f32 %v2426_v45, %v2023_v22 }
 0x2bb   :  { %v1975_v50 = vadd.f32 %v3693_v47, %v1970_v5  ;;  %v2044_v41 = vadd.f32 %v2427_v62, %v2024_v53  ;;  %v2050_v58 = vmul.f32 %v4093_v16, %v3704_v63  ;;  %v1976_v12 = vadd.f32 %v3693_v47, %v1971_v60 }
 0x2bc   :  { %v1986_v13 = vrot.slane %v1974_v57, %v2918_v24  ;;  %v2045_v44 = vadd.f32 %v2428_v6, %v2025_v26  ;;  %v2430_v28 = vrot.slane %v2048_v37, 10  ;;  %v2431_v3 = vrot.slane %v2049_v52, 10 }
 0x2bd   :  { %v1993_v4 = vrot.slane %v1975_v50, %v2918_v24  ;;  %v2432_v34 = vrot.slane %v2050_v58, 10  ;;  %v2068_v2 = vmul.f32 %v4094_v7, %v3711_v51  ;;  %v2000_v36 = vrot.slane %v1976_v12, %v2918_v24 }
 0x2be   :  { %v2063_v20 = vadd.f32 %v2430_v28, %v2043_v61  ;;  %v2069_v30 = vmul.f32 %v4094_v7, %v3713_v9  ;;  %v2070_v47 = vmul.f32 %v4094_v7, %v3704_v63  ;;  %v2064_v56 = vadd.f32 %v2431_v3, %v2044_v41 }
 0x2bf   :  { %v2001_v38 = vcombine.low %v1986_v13, %v1993_v4  ;;  %v2065_v11 = vadd.f32 %v2432_v34, %v2045_v44  ;;  %v2434_v18 = vrot.slane %v2068_v2, 11  ;;  %v2015_v42 = vrot.slane %v2000_v36, %v2918_v24 }
 0x2c0   :  { %v2435_v8 = vrot.slane %v2069_v30, 11  ;;  %v2436_v19 = vrot.slane %v2070_v47, 11  ;;  %v2142_v46 = vmul.f32 %v3686_v29, %v3711_v51  ;;  %v2143_v15 = vmul.f32 %v3686_v29, %v3713_v9 }
 0x2c1   :  { %v2008_v23 = vrot.slane %v2001_v38, %v2918_v24  ;;  %v2083_v31 = vadd.f32 %v2434_v18, %v2063_v20  ;;  %v2144_v39 = vmul.f32 %v3686_v29, %v3704_v63  ;;  %v2147_v0 = vmul.f32 %v3696_v49, %v3711_v51 }
 0x2c2   :  { %v2084_v14 = vadd.f32 %v2435_v8, %v2064_v56  ;;  %v2085_v22 = vadd.f32 %v2436_v19, %v2065_v11  ;;  %v2148_v27 = vmul.f32 %v3696_v49, %v3713_v9  ;;  %v2149_v33 = vmul.f32 %v3696_v49, %v3704_v63 }
 0x2c3   :  { %v2016_v53 = vcombine.low %v2008_v23, %v2015_v42  ;;  %v2088_v26 = vmul.f32 %v3716_v21, %v2083_v31  ;;  %v2167_v35 = vmul.f32 %v3699_v17, %v3711_v51  ;;  %v2441_v10 = vrot.slane %v2147_v0, 9 }
 0x2c4   :  { %v2089_v29 = vmul.f32 %v3716_v21, %v2084_v14  ;;  %v2090_v54 = vmul.f32 %v3716_v21, %v2085_v22  ;;  %v2442_v25 = vrot.slane %v2148_v27, 9  ;;  %v2443_v49 = vrot.slane %v2149_v33, 9 }
 0x2c5   :  { %2019 = vst.msk [vmem:[#allocation20 + $0x5] ss:$8 sm:$0xf] %vm3768_vm10, %v2016_v53  ;;  %2020 = vst.msk [vmem:[#allocation20 + $0x5] ss:$8 sm:$0x30] %vm3768_vm10, %v2016_v53  ;;  %v2093_v55 = vadd.f32 %v3719_v43, %v2088_v26  ;;  %v2168_v59 = vmul.f32 %v3699_v17, %v3713_v9  ;;  %v2169_v1 = vmul.f32 %v3699_v17, %v3704_v63  ;;  %v2206_v4 = vstv %s3995_s18 }
 0x2c6   :  { %v2094_v21 = vadd.f32 %v3719_v43, %v2089_v29  ;;  %v2095_v16 = vadd.f32 %v3719_v43, %v2090_v54  ;;  %v2162_v37 = vadd.f32 %v2441_v10, %v2142_v46  ;;  %v2163_v40 = vadd.f32 %v2442_v25, %v2143_v15 }
 0x2c7   :  { %v2105_v5 = vrot.slane %v2093_v55, %v2918_v24  ;;  %v2164_v45 = vadd.f32 %v2443_v49, %v2144_v39  ;;  %v2445_v62 = vrot.slane %v2167_v35, 10  ;;  %v2446_v60 = vrot.slane %v2168_v59, 10 }
 0x2c8   :  { %v2112_v57 = vrot.slane %v2094_v21, %v2918_v24  ;;  %v2119_v6 = vrot.slane %v2095_v16, %v2918_v24  ;;  %v2447_v52 = vrot.slane %v2169_v1, 10  ;;  %v2187_v17 = vmul.f32 %v3709_v32, %v3711_v51 }
 0x2c9   :  { %v2182_v50 = vadd.f32 %v2445_v62, %v2162_v37  ;;  %v2183_v61 = vadd.f32 %v2446_v60, %v2163_v40  ;;  %v2188_v43 = vmul.f32 %v3709_v32, %v3713_v9  ;;  %v2189_v41 = vmul.f32 %v3709_v32, %v3704_v63 }
 0x2ca   :  { %v2120_v58 = vcombine.low %v2105_v5, %v2112_v57  ;;  %v2184_v12 = vadd.f32 %v2447_v52, %v2164_v45  ;;  %v2449_v13 = vrot.slane %v2187_v17, 11  ;;  %v2134_v34 = vrot.slane %v2119_v6, %v2918_v24 }
 0x2cb   :  { %v2450_v44 = vrot.slane %v2188_v43, 11  ;;  %v2451_v28 = vrot.slane %v2189_v41, 11  ;;  %v2211_v36 = vstv %s2453_s19 }
 0x2cc   :  { %v2127_v3 = vrot.slane %v2120_v58, %v2918_v24  ;;  %v2202_v7 = vadd.f32 %v2449_v13, %v2182_v50 }
 0x2cd   :  { %v2203_v51 = vadd.f32 %v2450_v44, %v2183_v61  ;;  %v2204_v2 = vadd.f32 %v2451_v28, %v2184_v12 }
 0x2ce   :  { %v2135_v20 = vcombine.low %v2127_v3, %v2134_v34  ;;  %v2207_v30 = vmul.f32 %v2206_v4, %v2202_v7 }
 0x2cf   :  { %v2208_v9 = vmul.f32 %v2206_v4, %v2203_v51  ;;  %v2209_v47 = vmul.f32 %v2206_v4, %v2204_v2 }
 0x2d0   :  { %2138 = vst.msk [vmem:[#allocation20 + $0x6] ss:$8 sm:$0xf] %vm3768_vm10, %v2135_v20  ;;  %2139 = vst.msk [vmem:[#allocation20 + $0x6] ss:$8 sm:$0x30] %vm3768_vm10, %v2135_v20  ;;  %v2212_v63 = vadd.f32 %v2211_v36, %v2207_v30 }
 0x2d1   :  { %v2213_v32 = vadd.f32 %v2211_v36, %v2208_v9  ;;  %v2214_v38 = vadd.f32 %v2211_v36, %v2209_v47 }
 0x2d2   :  { %v2224_v56 = vrot.slane %v2212_v63, %v2918_v24 }
 0x2d3   :  { %v2231_v11 = vrot.slane %v2213_v32, %v2918_v24  ;;  %v2238_v18 = vrot.slane %v2214_v38, %v2918_v24 }
 0x2d5   :  { %v2239_v42 = vcombine.low %v2224_v56, %v2231_v11  ;;  %v2253_v19 = vrot.slane %v2238_v18, %v2918_v24 }
 0x2d7   :  { %v2246_v8 = vrot.slane %v2239_v42, %v2918_v24 }
 0x2d9   :  { %v2254_v46 = vcombine.low %v2246_v8, %v2253_v19 }
 0x2db   :  { %2257 = vst.msk [vmem:[#allocation20 + $0x7] ss:$8 sm:$0xf] %vm3768_vm10, %v2254_v46  ;;  %2258 = vst.msk [vmem:[#allocation20 + $0x7] ss:$8 sm:$0x30] %vm3768_vm10, %v2254_v46 }
 0x2dc   :  { %2640 = shalt.err (!%p2637_p11)
}
 0x2dd   :  { %s4095_s4 = sld [smem:[#allocation43_spill]] }
 0x2e3   :  { %2268 = dma.vmem_to_hbm [thread:$0]  %s2266_s20, 768, %s4095_s4, [#allocation5]  }
 0x2e4   :  { %2663 = dma.done.wait [#allocation5], 768  }
 0x2e5   :  { %2664 = vsyncadd [#allocation5], 4294966528 }
 0x2e6   :  { %2272 = vsyncpa [#allocation4], 1 }
 0x2e7   :  { %2273 = vsyncpa [#allocation9], 1 }
 0x2e8   :  { %2274 = vsyncpa [#allocation5], 1 }
 0x2e9   :  { %2275 = vsyncpa [#allocation6], 1 }
 0x2ea   :  { %2276 = vsyncpa [#allocation14], 1 }
 0x2eb   :  { %2277 = vsyncpa [#allocation7], 1 }
 0x2ec   :  { %2278 = vsyncpa [#allocation16], 1 }
 0x2ed   :  { %2279 = vsyncpa [#allocation19], 1 }

</bundles_post_ra>
